<compile_context>
chip_gen: v7x
topology: tpu7x:2x2x1
jax: 0.10.0
libtpu: 0.0.40
codegen_flags: <defaults>
</compile_context>

<pallas_src>
import jax
import jax.numpy as jnp
from jax.experimental import pallas as pl
from jax.experimental.pallas import tpu as pltpu


# ----------------------------------------------------------------------------
# Kernel bodies
# ----------------------------------------------------------------------------
def _conv3x3_core(x, w_ref, y_ref, psum_ref, psumsq_ref):
    """3x3 'same' conv of one (H, W, Cin) activation + BN partial-sum epilogue.

    x:          (H, W, Cin) float32 value (post-prologue activation)
    w_ref:      (9*Cin, Cout) weight slab, row order = (kh, kw, cin)
    y_ref:      (1, H, W, Cout) raw conv output (pre-BN)
    psum_ref:   (1, 1, Cout) per-batch channel sums of y
    psumsq_ref: (1, 1, Cout) per-batch channel sums of y*y
    """
    H, W, Cin = x.shape
    Cout = y_ref.shape[-1]

    # Zero halo built in VMEM (no HBM pad round-trip in the wrapper).
    zrow = jnp.zeros((1, W, Cin), jnp.float32)
    xp = jnp.concatenate([zrow, x, zrow], axis=0)            # (H+2, W, Cin)
    zcol = jnp.zeros((H + 2, 1, Cin), jnp.float32)
    xp = jnp.concatenate([zcol, xp, zcol], axis=1)           # (H+2, W+2, Cin)

    # im2col: one (H*W, 9*Cin) patch matrix -> a single MXU matmul.
    taps = [xp[kh:kh + H, kw:kw + W, :]                      # (H, W, Cin) each
            for kh in range(3) for kw in range(3)]
    patches = jnp.concatenate(taps, axis=-1).reshape(H * W, 9 * Cin)
    acc = jnp.dot(patches, w_ref[...],
                  preferred_element_type=jnp.float32)        # (H*W, Cout)

    y_ref[...] = acc.reshape(1, H, W, Cout).astype(y_ref.dtype)
    # BN statistics epilogue: per-batch partial sums (reduced across N outside).
    psum_ref[...] = jnp.sum(acc, axis=0, keepdims=True)[None]            # (1,1,Cout)
    psumsq_ref[...] = jnp.sum(acc * acc, axis=0, keepdims=True)[None]    # (1,1,Cout)


def _pool_conv_kernel(x_ref, w_ref, y_ref, psum_ref, psumsq_ref):
    """MaxPool2d(2,2) prologue + conv1 for one batch element.

    x_ref: (1, H, 2, W, 2*Cin) -- contiguous row-major view of the original
           (1, 2H, 2W, Cin) NHWC tile: [0, h, a, w, :] holds input rows 2h+a,
           with lanes [:Cin] = column 2w and lanes [Cin:] = column 2w+1.
    """
    _, H, _, W, twoC = x_ref.shape
    Cin = twoC // 2
    r0 = x_ref[0, :, 0, :, :].astype(jnp.float32)            # rows 2h
    r1 = x_ref[0, :, 1, :, :].astype(jnp.float32)            # rows 2h+1
    hmax = jnp.maximum(r0, r1)                               # (H, W, 2*Cin)
    pooled = jnp.maximum(hmax[:, :, :Cin], hmax[:, :, Cin:])  # (H, W, Cin)
    _conv3x3_core(pooled, w_ref, y_ref, psum_ref, psumsq_ref)


def _bnrelu_conv_kernel(x_ref, scale_ref, shift_ref, w_ref,
                        y_ref, psum_ref, psumsq_ref):
    """BN+ReLU prologue (previous layer's batch stats) + conv for one batch elt.

    x_ref: (1, H, W, Cin) raw previous-conv output; scale/shift: (1, Cin).
    """
    _, H, W, Cin = x_ref.shape
    scale = scale_ref[...].reshape(1, 1, Cin)
    shift = shift_ref[...].reshape(1, 1, Cin)
    x = jnp.maximum(x_ref[0].astype(jnp.float32) * scale + shift, 0.0)
    _conv3x3_core(x, w_ref, y_ref, psum_ref, psumsq_ref)


def _bn_relu_kernel(y_ref, scale_ref, shift_ref, o_ref):
    """Final BN + ReLU (no downstream conv to fuse into)."""
    C = o_ref.shape[-1]
    scale = scale_ref[...].reshape(1, 1, 1, C)
    shift = shift_ref[...].reshape(1, 1, 1, C)
    out = y_ref[...].astype(jnp.float32) * scale + shift
    o_ref[...] = jnp.maximum(out, 0.0).astype(o_ref.dtype)


# ----------------------------------------------------------------------------
# pallas_call wrappers
# ----------------------------------------------------------------------------
def pool_conv(x_nhwc, w):
    """MaxPool2d(2,2) + 3x3 'same' conv (no bias) + per-batch BN partial sums."""
    N, H2, W2, Cin = x_nhwc.shape
    H, W = H2 // 2, W2 // 2
    Cout = w.shape[-1]
    # Contiguous row-major regrouping; XLA fuses this with the NCHW->NHWC copy.
    xv = x_nhwc.reshape(N, H, 2, W, 2 * Cin)
    wm = w.reshape(9 * Cin, Cout)
    stat_shape = jax.ShapeDtypeStruct((N, 1, Cout), jnp.float32)
    stat_spec = pl.BlockSpec((1, 1, Cout), lambda n: (n, 0, 0))
    return pl.pallas_call(
        _pool_conv_kernel,
        out_shape=(jax.ShapeDtypeStruct((N, H, W, Cout), jnp.float32),
                   stat_shape, stat_shape),
        grid=(N,),
        in_specs=[
            pl.BlockSpec((1, H, 2, W, 2 * Cin), lambda n: (n, 0, 0, 0, 0)),
            pl.BlockSpec((9 * Cin, Cout), lambda n: (0, 0)),
        ],
        out_specs=(pl.BlockSpec((1, H, W, Cout), lambda n: (n, 0, 0, 0)),
                   stat_spec, stat_spec),
        compiler_params=pltpu.CompilerParams(dimension_semantics=("parallel",)),
    )(xv, wm)


def bnrelu_conv(y_prev, scale, shift, w):
    """(BN + ReLU of previous layer) fused as prologue + 3x3 conv + BN partial sums."""
    N, H, W, Cin = y_prev.shape
    Cout = w.shape[-1]
    wm = w.reshape(9 * Cin, Cout)
    stat_shape = jax.ShapeDtypeStruct((N, 1, Cout), jnp.float32)
    stat_spec = pl.BlockSpec((1, 1, Cout), lambda n: (n, 0, 0))
    return pl.pallas_call(
        _bnrelu_conv_kernel,
        out_shape=(jax.ShapeDtypeStruct((N, H, W, Cout), jnp.float32),
                   stat_shape, stat_shape),
        grid=(N,),
        in_specs=[
            pl.BlockSpec((1, H, W, Cin), lambda n: (n, 0, 0, 0)),
            pl.BlockSpec((1, Cin), lambda n: (0, 0)),
            pl.BlockSpec((1, Cin), lambda n: (0, 0)),
            pl.BlockSpec((9 * Cin, Cout), lambda n: (0, 0)),
        ],
        out_specs=(pl.BlockSpec((1, H, W, Cout), lambda n: (n, 0, 0, 0)),
                   stat_spec, stat_spec),
        compiler_params=pltpu.CompilerParams(dimension_semantics=("parallel",)),
    )(y_prev, scale, shift, wm)


def bn_relu(y, scale, shift):
    N, H, W, C = y.shape
    return pl.pallas_call(
        _bn_relu_kernel,
        out_shape=jax.ShapeDtypeStruct((N, H, W, C), jnp.float32),
        grid=(N,),
        in_specs=[
            pl.BlockSpec((1, H, W, C), lambda n: (n, 0, 0, 0)),
            pl.BlockSpec((1, C), lambda n: (0, 0)),
            pl.BlockSpec((1, C), lambda n: (0, 0)),
        ],
        out_specs=pl.BlockSpec((1, H, W, C), lambda n: (n, 0, 0, 0)),
        compiler_params=pltpu.CompilerParams(dimension_semantics=("parallel",)),
    )(y, scale, shift)


def _bn_affine(psum, psumsq, gamma, beta, count, eps):
    """Fold the kernels' per-batch partial sums into BN scale/shift (tiny (C,) math)."""
    s = jnp.sum(psum, axis=(0, 1))                    # (C,)
    ss = jnp.sum(psumsq, axis=(0, 1))                 # (C,)
    mean = s / count
    var = jnp.maximum(ss / count - mean * mean, 0.0)  # biased variance, clamped >= 0
    scale = gamma * jax.lax.rsqrt(var + eps)
    shift = beta - mean * scale
    return scale[None, :], shift[None, :]             # (1, C) each


# ----------------------------------------------------------------------------
# Down forward
# ----------------------------------------------------------------------------
def down_forward(x_nchw, params, eps=1e-5):
    """Down: MaxPool2d(2,2) -> [Conv3x3 -> BN(batch stats) -> ReLU] x 2. NCHW I/O."""
    x = jnp.transpose(x_nchw, (0, 2, 3, 1)).astype(jnp.float32)   # NHWC (H, W even)
    N, H2, W2, _ = x.shape
    H, W = H2 // 2, W2 // 2
    count = N * H * W

    # layer 1: maxpool + conv1 fused; BN1 partial stats as epilogue
    y1, s1, ss1 = pool_conv(x, params["w1"])
    scale1, shift1 = _bn_affine(s1, ss1, params["gamma1"], params["beta1"], count, eps)

    # layer 2: BN1+ReLU fused as conv2 prologue; BN2 partial stats as epilogue
    y2, s2, ss2 = bnrelu_conv(y1, scale1, shift1, params["w2"])
    scale2, shift2 = _bn_affine(s2, ss2, params["gamma2"], params["beta2"], count, eps)

    # final BN2 + ReLU
    out = bn_relu(y2, scale2, shift2)
    return jnp.transpose(out, (0, 3, 1, 2))                       # NCHW


def init_params(key, in_ch, out_ch):
    """Synthetic parameters. Conv weights stored as (KH, KW, Cin, Cout).
    Conv biases are omitted: training-mode BatchNorm subtracts the batch mean,
    which exactly cancels any per-channel constant bias (variance is shift-invariant),
    so the forward output is unchanged."""
    k1, k2 = jax.random.split(key)
    bound1 = 1.0 / jnp.sqrt(in_ch * 9.0)
    bound2 = 1.0 / jnp.sqrt(out_ch * 9.0)
    return {
        "w1": jax.random.uniform(k1, (3, 3, in_ch, out_ch), jnp.float32, -bound1, bound1),
        "gamma1": jnp.ones((out_ch,), jnp.float32),
        "beta1": jnp.zeros((out_ch,), jnp.float32),
        "w2": jax.random.uniform(k2, (3, 3, out_ch, out_ch), jnp.float32, -bound2, bound2),
        "gamma2": jnp.ones((out_ch,), jnp.float32),
        "beta2": jnp.zeros((out_ch,), jnp.float32),
    }


def _reference(x_nchw, params, eps=1e-5):
    """Pure-JAX (XLA) reference of the same forward pass, for validation."""
    x = jnp.transpose(x_nchw, (0, 2, 3, 1)).astype(jnp.float32)
    N, H2, W2, C = x.shape
    x = jnp.max(x.reshape(N, H2 // 2, 2, W2 // 2, 2, C), axis=(2, 4))

    def conv_bn_relu(h, w, gamma, beta):
        y = jax.lax.conv_general_dilated(
            h, w, window_strides=(1, 1), padding="SAME",
            dimension_numbers=("NHWC", "HWIO", "NHWC"),
            precision=jax.lax.Precision.HIGHEST)
        mean = jnp.mean(y, axis=(0, 1, 2))
        var = jnp.mean(jnp.square(y - mean), axis=(0, 1, 2))
        y = (y - mean) * jax.lax.rsqrt(var + eps) * gamma + beta
        return jnp.maximum(y, 0.0)

    y = conv_bn_relu(x, params["w1"], params["gamma1"], params["beta1"])
    y = conv_bn_relu(y, params["w2"], params["gamma2"], params["beta2"])
    return jnp.transpose(y, (0, 3, 1, 2))


if __name__ == "__main__":
    N, IN_CH, OUT_CH, H, W = 2, 4, 8, 16, 16

    key = jax.random.PRNGKey(0)
    kx, kp = jax.random.split(key)
    x = jax.random.normal(kx, (N, IN_CH, H, W), dtype=jnp.float32)   # NCHW input
    params = init_params(kp, IN_CH, OUT_CH)

    out = jax.jit(down_forward)(x, params)
    out = jax.block_until_ready(out)

    assert out.shape == (N, OUT_CH, H // 2, W // 2), out.shape
    assert bool(jnp.all(out >= 0.0)), "ReLU output must be non-negative"

    ref = _reference(x, params)
    err = float(jnp.max(jnp.abs(out - ref)))
    assert bool(jnp.allclose(out, ref, rtol=1e-3, atol=1e-3)), f"max abs err {err}"

    print("KERNEL_OK")
</pallas_src>

<mosaic_0001>
module attributes {stable_mosaic.version = 11 : i64} {
  func.func @_pool_conv_kernel(%arg0: i32, %arg1: memref<1x8x2x8x8xf32, #tpu.memory_space<vmem>>, %arg2: memref<36x8xf32, #tpu.memory_space<vmem>>, %arg3: memref<1x8x8x8xf32, #tpu.memory_space<vmem>>, %arg4: memref<1x1x8xf32, #tpu.memory_space<vmem>>, %arg5: memref<1x1x8xf32, #tpu.memory_space<vmem>>) attributes {dimension_semantics = [#tpu.dimension_semantics<parallel>], iteration_bounds = array<i64: 2>, scalar_prefetch = 0 : i64, scratch_operands = 0 : i64, tpu.core_type = #tpu.core_type<tc>, window_params = [{transform_indices = @transform_0, window_bounds = array<i64: 1, 8, 2, 8, 8>}, {pipeline_mode = #tpu.pipeline_mode<synchronous>, transform_indices = @transform_1, window_bounds = array<i64: 36, 8>}, {transform_indices = @transform_2, window_bounds = array<i64: 1, 8, 8, 8>}, {transform_indices = @transform_3, window_bounds = array<i64: 1, 1, 8>}, {transform_indices = @transform_4, window_bounds = array<i64: 1, 1, 8>}]} {
    %c0 = arith.constant 0 : index
    %c0_0 = arith.constant 0 : index
    %c0_1 = arith.constant 0 : index
    %c0_2 = arith.constant 0 : index
    %c0_3 = arith.constant 0 : index
    %0 = vector.load %arg1[%c0, %c0_0, %c0_1, %c0_2, %c0_3] : memref<1x8x2x8x8xf32, #tpu.memory_space<vmem>>, vector<1x8x1x8x8xf32>
    %1 = vector.shape_cast %0 : vector<1x8x1x8x8xf32> to vector<8x8x8xf32>
    %c0_4 = arith.constant 0 : index
    %c0_5 = arith.constant 0 : index
    %c1 = arith.constant 1 : index
    %c0_6 = arith.constant 0 : index
    %c0_7 = arith.constant 0 : index
    %2 = vector.load %arg1[%c0_4, %c0_5, %c1, %c0_6, %c0_7] : memref<1x8x2x8x8xf32, #tpu.memory_space<vmem>>, vector<1x8x1x8x8xf32>
    %3 = vector.shape_cast %2 : vector<1x8x1x8x8xf32> to vector<8x8x8xf32>
    %4 = arith.maximumf %1, %3 : vector<8x8x8xf32>
    %5 = vector.extract_strided_slice %4 {offsets = [0, 0, 0], sizes = [8, 8, 4], strides = [1, 1, 1]} : vector<8x8x8xf32> to vector<8x8x4xf32>
    %6 = vector.extract_strided_slice %4 {offsets = [0, 0, 4], sizes = [8, 8, 4], strides = [1, 1, 1]} : vector<8x8x8xf32> to vector<8x8x4xf32>
    %7 = arith.maximumf %5, %6 : vector<8x8x4xf32>
    %cst = arith.constant 0.000000e+00 : f32
    %8 = vector.broadcast %cst : f32 to vector<1x8x4xf32>
    %9 = tpu.concatenate %8, %7, %8 in 0 : vector<1x8x4xf32>, vector<8x8x4xf32>, vector<1x8x4xf32> -> vector<10x8x4xf32>
    %cst_8 = arith.constant 0.000000e+00 : f32
    %10 = vector.broadcast %cst_8 : f32 to vector<10x1x4xf32>
    %11 = tpu.concatenate %10, %9, %10 in 1 : vector<10x1x4xf32>, vector<10x8x4xf32>, vector<10x1x4xf32> -> vector<10x10x4xf32>
    %12 = vector.extract_strided_slice %11 {offsets = [0, 0, 0], sizes = [8, 8, 4], strides = [1, 1, 1]} : vector<10x10x4xf32> to vector<8x8x4xf32>
    %13 = vector.extract_strided_slice %11 {offsets = [0, 1, 0], sizes = [8, 8, 4], strides = [1, 1, 1]} : vector<10x10x4xf32> to vector<8x8x4xf32>
    %14 = vector.extract_strided_slice %11 {offsets = [0, 2, 0], sizes = [8, 8, 4], strides = [1, 1, 1]} : vector<10x10x4xf32> to vector<8x8x4xf32>
    %15 = vector.extract_strided_slice %11 {offsets = [1, 0, 0], sizes = [8, 8, 4], strides = [1, 1, 1]} : vector<10x10x4xf32> to vector<8x8x4xf32>
    %16 = vector.extract_strided_slice %11 {offsets = [1, 1, 0], sizes = [8, 8, 4], strides = [1, 1, 1]} : vector<10x10x4xf32> to vector<8x8x4xf32>
    %17 = vector.extract_strided_slice %11 {offsets = [1, 2, 0], sizes = [8, 8, 4], strides = [1, 1, 1]} : vector<10x10x4xf32> to vector<8x8x4xf32>
    %18 = vector.extract_strided_slice %11 {offsets = [2, 0, 0], sizes = [8, 8, 4], strides = [1, 1, 1]} : vector<10x10x4xf32> to vector<8x8x4xf32>
    %19 = vector.extract_strided_slice %11 {offsets = [2, 1, 0], sizes = [8, 8, 4], strides = [1, 1, 1]} : vector<10x10x4xf32> to vector<8x8x4xf32>
    %20 = vector.extract_strided_slice %11 {offsets = [2, 2, 0], sizes = [8, 8, 4], strides = [1, 1, 1]} : vector<10x10x4xf32> to vector<8x8x4xf32>
    %21 = tpu.concatenate %12, %13, %14, %15, %16, %17, %18, %19, %20 in 2 : vector<8x8x4xf32>, vector<8x8x4xf32>, vector<8x8x4xf32>, vector<8x8x4xf32>, vector<8x8x4xf32>, vector<8x8x4xf32>, vector<8x8x4xf32>, vector<8x8x4xf32>, vector<8x8x4xf32> -> vector<8x8x36xf32>
    %22 = vector.shape_cast %21 : vector<8x8x36xf32> to vector<64x36xf32>
    %c0_9 = arith.constant 0 : index
    %c0_10 = arith.constant 0 : index
    %23 = vector.load %arg2[%c0_9, %c0_10] : memref<36x8xf32, #tpu.memory_space<vmem>>, vector<36x8xf32>
    %cst_11 = arith.constant dense<0.000000e+00> : vector<64x8xf32>
    %24 = tpu.matmul %22, %23, %cst_11 {dimension_numbers = #tpu.dot_dimension_numbers<[1], [0], [0], [1], [0, 0, 1, 1], [], []>} : vector<64x36xf32>, vector<36x8xf32>, vector<64x8xf32> -> vector<64x8xf32>
    %25 = vector.shape_cast %24 : vector<64x8xf32> to vector<1x8x8x8xf32>
    %c0_12 = arith.constant 0 : index
    %c0_13 = arith.constant 0 : index
    %c0_14 = arith.constant 0 : index
    %c0_15 = arith.constant 0 : index
    %26 = vector.load %arg3[%c0_12, %c0_13, %c0_14, %c0_15] : memref<1x8x8x8xf32, #tpu.memory_space<vmem>>, vector<1x8x8x8xf32>
    tpu.vector_store %arg3[%c0_12, %c0_13, %c0_14, %c0_15], %25 {strides = array<i32>} : memref<1x8x8x8xf32, #tpu.memory_space<vmem>>, vector<1x8x8x8xf32>,
    %cst_16 = arith.constant dense<0.000000e+00> : vector<8xf32>
    %27 = vector.multi_reduction <add>, %24, %cst_16 [0] : vector<64x8xf32> to vector<8xf32>
    %28 = vector.shape_cast %27 : vector<8xf32> to vector<1x8xf32>
    %29 = vector.shape_cast %28 : vector<1x8xf32> to vector<1x1x8xf32>
    %c0_17 = arith.constant 0 : index
    %c0_18 = arith.constant 0 : index
    %c0_19 = arith.constant 0 : index
    %30 = vector.load %arg4[%c0_17, %c0_18, %c0_19] : memref<1x1x8xf32, #tpu.memory_space<vmem>>, vector<1x1x8xf32>
    tpu.vector_store %arg4[%c0_17, %c0_18, %c0_19], %29 {strides = array<i32>} : memref<1x1x8xf32, #tpu.memory_space<vmem>>, vector<1x1x8xf32>,
    %31 = arith.mulf %24, %24 : vector<64x8xf32>
    %cst_20 = arith.constant dense<0.000000e+00> : vector<8xf32>
    %32 = vector.multi_reduction <add>, %31, %cst_20 [0] : vector<64x8xf32> to vector<8xf32>
    %33 = vector.shape_cast %32 : vector<8xf32> to vector<1x8xf32>
    %34 = vector.shape_cast %33 : vector<1x8xf32> to vector<1x1x8xf32>
    %c0_21 = arith.constant 0 : index
    %c0_22 = arith.constant 0 : index
    %c0_23 = arith.constant 0 : index
    %35 = vector.load %arg5[%c0_21, %c0_22, %c0_23] : memref<1x1x8xf32, #tpu.memory_space<vmem>>, vector<1x1x8xf32>
    tpu.vector_store %arg5[%c0_21, %c0_22, %c0_23], %34 {strides = array<i32>} : memref<1x1x8xf32, #tpu.memory_space<vmem>>, vector<1x1x8xf32>,
    return
  }
  func.func @transform_0(%arg0: i32) -> (i32, i32, i32, i32, i32) {
    %c0_i32 = arith.constant 0 : i32
    %c0_i32_0 = arith.constant 0 : i32
    %c0_i32_1 = arith.constant 0 : i32
    %c0_i32_2 = arith.constant 0 : i32
    %c0_i32_3 = arith.constant 0 : i32
    return %arg0, %c0_i32, %c0_i32_0, %c0_i32_1, %c0_i32_2 : i32, i32, i32, i32, i32
  }
  func.func @transform_1(%arg0: i32) -> (i32, i32) {
    %c0_i32 = arith.constant 0 : i32
    %c0_i32_0 = arith.constant 0 : i32
    %c0_i32_1 = arith.constant 0 : i32
    return %c0_i32, %c0_i32_0 : i32, i32
  }
  func.func @transform_2(%arg0: i32) -> (i32, i32, i32, i32) {
    %c0_i32 = arith.constant 0 : i32
    %c0_i32_0 = arith.constant 0 : i32
    %c0_i32_1 = arith.constant 0 : i32
    %c0_i32_2 = arith.constant 0 : i32
    return %arg0, %c0_i32, %c0_i32_0, %c0_i32_1 : i32, i32, i32, i32
  }
  func.func @transform_3(%arg0: i32) -> (i32, i32, i32) {
    %c0_i32 = arith.constant 0 : i32
    %c0_i32_0 = arith.constant 0 : i32
    %c0_i32_1 = arith.constant 0 : i32
    return %arg0, %c0_i32, %c0_i32_0 : i32, i32, i32
  }
  func.func @transform_4(%arg0: i32) -> (i32, i32, i32) {
    %c0_i32 = arith.constant 0 : i32
    %c0_i32_0 = arith.constant 0 : i32
    %c0_i32_1 = arith.constant 0 : i32
    return %arg0, %c0_i32, %c0_i32_0 : i32, i32, i32
  }
}

module attributes {stable_mosaic.version = 11 : i64} {
  func.func @_bnrelu_conv_kernel(%arg0: i32, %arg1: memref<1x8x8x8xf32, #tpu.memory_space<vmem>>, %arg2: memref<1x8xf32, #tpu.memory_space<vmem>>, %arg3: memref<1x8xf32, #tpu.memory_space<vmem>>, %arg4: memref<72x8xf32, #tpu.memory_space<vmem>>, %arg5: memref<1x8x8x8xf32, #tpu.memory_space<vmem>>, %arg6: memref<1x1x8xf32, #tpu.memory_space<vmem>>, %arg7: memref<1x1x8xf32, #tpu.memory_space<vmem>>) attributes {dimension_semantics = [#tpu.dimension_semantics<parallel>], iteration_bounds = array<i64: 2>, scalar_prefetch = 0 : i64, scratch_operands = 0 : i64, tpu.core_type = #tpu.core_type<tc>, window_params = [{transform_indices = @transform_0, window_bounds = array<i64: 1, 8, 8, 8>}, {pipeline_mode = #tpu.pipeline_mode<synchronous>, transform_indices = @transform_1, window_bounds = array<i64: 1, 8>}, {pipeline_mode = #tpu.pipeline_mode<synchronous>, transform_indices = @transform_2, window_bounds = array<i64: 1, 8>}, {pipeline_mode = #tpu.pipeline_mode<synchronous>, transform_indices = @transform_3, window_bounds = array<i64: 72, 8>}, {transform_indices = @transform_4, window_bounds = array<i64: 1, 8, 8, 8>}, {transform_indices = @transform_5, window_bounds = array<i64: 1, 1, 8>}, {transform_indices = @transform_6, window_bounds = array<i64: 1, 1, 8>}]} {
    %c0 = arith.constant 0 : index
    %c0_0 = arith.constant 0 : index
    %0 = vector.load %arg2[%c0, %c0_0] : memref<1x8xf32, #tpu.memory_space<vmem>>, vector<1x8xf32>
    %1 = vector.shape_cast %0 : vector<1x8xf32> to vector<1x1x8xf32>
    %c0_1 = arith.constant 0 : index
    %c0_2 = arith.constant 0 : index
    %2 = vector.load %arg3[%c0_1, %c0_2] : memref<1x8xf32, #tpu.memory_space<vmem>>, vector<1x8xf32>
    %3 = vector.shape_cast %2 : vector<1x8xf32> to vector<1x1x8xf32>
    %c0_3 = arith.constant 0 : index
    %c0_4 = arith.constant 0 : index
    %c0_5 = arith.constant 0 : index
    %c0_6 = arith.constant 0 : index
    %4 = vector.load %arg1[%c0_3, %c0_4, %c0_5, %c0_6] : memref<1x8x8x8xf32, #tpu.memory_space<vmem>>, vector<1x8x8x8xf32>
    %5 = vector.shape_cast %4 : vector<1x8x8x8xf32> to vector<8x8x8xf32>
    %6 = vector.broadcast %1 : vector<1x1x8xf32> to vector<8x8x8xf32>
    %7 = arith.mulf %5, %6 : vector<8x8x8xf32>
    %8 = vector.broadcast %3 : vector<1x1x8xf32> to vector<8x8x8xf32>
    %9 = arith.addf %7, %8 : vector<8x8x8xf32>
    %cst = arith.constant 0.000000e+00 : f32
    %10 = vector.broadcast %cst : f32 to vector<8x8x8xf32>
    %11 = arith.maximumf %9, %10 : vector<8x8x8xf32>
    %cst_7 = arith.constant 0.000000e+00 : f32
    %12 = vector.broadcast %cst_7 : f32 to vector<1x8x8xf32>
    %13 = tpu.concatenate %12, %11, %12 in 0 : vector<1x8x8xf32>, vector<8x8x8xf32>, vector<1x8x8xf32> -> vector<10x8x8xf32>
    %cst_8 = arith.constant 0.000000e+00 : f32
    %14 = vector.broadcast %cst_8 : f32 to vector<10x1x8xf32>
    %15 = tpu.concatenate %14, %13, %14 in 1 : vector<10x1x8xf32>, vector<10x8x8xf32>, vector<10x1x8xf32> -> vector<10x10x8xf32>
    %16 = vector.extract_strided_slice %15 {offsets = [0, 0, 0], sizes = [8, 8, 8], strides = [1, 1, 1]} : vector<10x10x8xf32> to vector<8x8x8xf32>
    %17 = vector.extract_strided_slice %15 {offsets = [0, 1, 0], sizes = [8, 8, 8], strides = [1, 1, 1]} : vector<10x10x8xf32> to vector<8x8x8xf32>
    %18 = vector.extract_strided_slice %15 {offsets = [0, 2, 0], sizes = [8, 8, 8], strides = [1, 1, 1]} : vector<10x10x8xf32> to vector<8x8x8xf32>
    %19 = vector.extract_strided_slice %15 {offsets = [1, 0, 0], sizes = [8, 8, 8], strides = [1, 1, 1]} : vector<10x10x8xf32> to vector<8x8x8xf32>
    %20 = vector.extract_strided_slice %15 {offsets = [1, 1, 0], sizes = [8, 8, 8], strides = [1, 1, 1]} : vector<10x10x8xf32> to vector<8x8x8xf32>
    %21 = vector.extract_strided_slice %15 {offsets = [1, 2, 0], sizes = [8, 8, 8], strides = [1, 1, 1]} : vector<10x10x8xf32> to vector<8x8x8xf32>
    %22 = vector.extract_strided_slice %15 {offsets = [2, 0, 0], sizes = [8, 8, 8], strides = [1, 1, 1]} : vector<10x10x8xf32> to vector<8x8x8xf32>
    %23 = vector.extract_strided_slice %15 {offsets = [2, 1, 0], sizes = [8, 8, 8], strides = [1, 1, 1]} : vector<10x10x8xf32> to vector<8x8x8xf32>
    %24 = vector.extract_strided_slice %15 {offsets = [2, 2, 0], sizes = [8, 8, 8], strides = [1, 1, 1]} : vector<10x10x8xf32> to vector<8x8x8xf32>
    %25 = tpu.concatenate %16, %17, %18, %19, %20, %21, %22, %23, %24 in 2 : vector<8x8x8xf32>, vector<8x8x8xf32>, vector<8x8x8xf32>, vector<8x8x8xf32>, vector<8x8x8xf32>, vector<8x8x8xf32>, vector<8x8x8xf32>, vector<8x8x8xf32>, vector<8x8x8xf32> -> vector<8x8x72xf32>
    %26 = vector.shape_cast %25 : vector<8x8x72xf32> to vector<64x72xf32>
    %c0_9 = arith.constant 0 : index
    %c0_10 = arith.constant 0 : index
    %27 = vector.load %arg4[%c0_9, %c0_10] : memref<72x8xf32, #tpu.memory_space<vmem>>, vector<72x8xf32>
    %cst_11 = arith.constant dense<0.000000e+00> : vector<64x8xf32>
    %28 = tpu.matmul %26, %27, %cst_11 {dimension_numbers = #tpu.dot_dimension_numbers<[1], [0], [0], [1], [0, 0, 1, 1], [], []>} : vector<64x72xf32>, vector<72x8xf32>, vector<64x8xf32> -> vector<64x8xf32>
    %29 = vector.shape_cast %28 : vector<64x8xf32> to vector<1x8x8x8xf32>
    %c0_12 = arith.constant 0 : index
    %c0_13 = arith.constant 0 : index
    %c0_14 = arith.constant 0 : index
    %c0_15 = arith.constant 0 : index
    %30 = vector.load %arg5[%c0_12, %c0_13, %c0_14, %c0_15] : memref<1x8x8x8xf32, #tpu.memory_space<vmem>>, vector<1x8x8x8xf32>
    tpu.vector_store %arg5[%c0_12, %c0_13, %c0_14, %c0_15], %29 {strides = array<i32>} : memref<1x8x8x8xf32, #tpu.memory_space<vmem>>, vector<1x8x8x8xf32>,
    %cst_16 = arith.constant dense<0.000000e+00> : vector<8xf32>
    %31 = vector.multi_reduction <add>, %28, %cst_16 [0] : vector<64x8xf32> to vector<8xf32>
    %32 = vector.shape_cast %31 : vector<8xf32> to vector<1x8xf32>
    %33 = vector.shape_cast %32 : vector<1x8xf32> to vector<1x1x8xf32>
    %c0_17 = arith.constant 0 : index
    %c0_18 = arith.constant 0 : index
    %c0_19 = arith.constant 0 : index
    %34 = vector.load %arg6[%c0_17, %c0_18, %c0_19] : memref<1x1x8xf32, #tpu.memory_space<vmem>>, vector<1x1x8xf32>
    tpu.vector_store %arg6[%c0_17, %c0_18, %c0_19], %33 {strides = array<i32>} : memref<1x1x8xf32, #tpu.memory_space<vmem>>, vector<1x1x8xf32>,
    %35 = arith.mulf %28, %28 : vector<64x8xf32>
    %cst_20 = arith.constant dense<0.000000e+00> : vector<8xf32>
    %36 = vector.multi_reduction <add>, %35, %cst_20 [0] : vector<64x8xf32> to vector<8xf32>
    %37 = vector.shape_cast %36 : vector<8xf32> to vector<1x8xf32>
    %38 = vector.shape_cast %37 : vector<1x8xf32> to vector<1x1x8xf32>
    %c0_21 = arith.constant 0 : index
    %c0_22 = arith.constant 0 : index
    %c0_23 = arith.constant 0 : index
    %39 = vector.load %arg7[%c0_21, %c0_22, %c0_23] : memref<1x1x8xf32, #tpu.memory_space<vmem>>, vector<1x1x8xf32>
    tpu.vector_store %arg7[%c0_21, %c0_22, %c0_23], %38 {strides = array<i32>} : memref<1x1x8xf32, #tpu.memory_space<vmem>>, vector<1x1x8xf32>,
    return
  }
  func.func @transform_0(%arg0: i32) -> (i32, i32, i32, i32) {
    %c0_i32 = arith.constant 0 : i32
    %c0_i32_0 = arith.constant 0 : i32
    %c0_i32_1 = arith.constant 0 : i32
    %c0_i32_2 = arith.constant 0 : i32
    return %arg0, %c0_i32, %c0_i32_0, %c0_i32_1 : i32, i32, i32, i32
  }
  func.func @transform_1(%arg0: i32) -> (i32, i32) {
    %c0_i32 = arith.constant 0 : i32
    %c0_i32_0 = arith.constant 0 : i32
    %c0_i32_1 = arith.constant 0 : i32
    return %c0_i32, %c0_i32_0 : i32, i32
  }
  func.func @transform_2(%arg0: i32) -> (i32, i32) {
    %c0_i32 = arith.constant 0 : i32
    %c0_i32_0 = arith.constant 0 : i32
    %c0_i32_1 = arith.constant 0 : i32
    return %c0_i32, %c0_i32_0 : i32, i32
  }
  func.func @transform_3(%arg0: i32) -> (i32, i32) {
    %c0_i32 = arith.constant 0 : i32
    %c0_i32_0 = arith.constant 0 : i32
    %c0_i32_1 = arith.constant 0 : i32
    return %c0_i32, %c0_i32_0 : i32, i32
  }
  func.func @transform_4(%arg0: i32) -> (i32, i32, i32, i32) {
    %c0_i32 = arith.constant 0 : i32
    %c0_i32_0 = arith.constant 0 : i32
    %c0_i32_1 = arith.constant 0 : i32
    %c0_i32_2 = arith.constant 0 : i32
    return %arg0, %c0_i32, %c0_i32_0, %c0_i32_1 : i32, i32, i32, i32
  }
  func.func @transform_5(%arg0: i32) -> (i32, i32, i32) {
    %c0_i32 = arith.constant 0 : i32
    %c0_i32_0 = arith.constant 0 : i32
    %c0_i32_1 = arith.constant 0 : i32
    return %arg0, %c0_i32, %c0_i32_0 : i32, i32, i32
  }
  func.func @transform_6(%arg0: i32) -> (i32, i32, i32) {
    %c0_i32 = arith.constant 0 : i32
    %c0_i32_0 = arith.constant 0 : i32
    %c0_i32_1 = arith.constant 0 : i32
    return %arg0, %c0_i32, %c0_i32_0 : i32, i32, i32
  }
}

module attributes {stable_mosaic.version = 11 : i64} {
  func.func @_bn_relu_kernel(%arg0: i32, %arg1: memref<1x8x8x8xf32, #tpu.memory_space<vmem>>, %arg2: memref<1x8xf32, #tpu.memory_space<vmem>>, %arg3: memref<1x8xf32, #tpu.memory_space<vmem>>, %arg4: memref<1x8x8x8xf32, #tpu.memory_space<vmem>>) attributes {dimension_semantics = [#tpu.dimension_semantics<parallel>], iteration_bounds = array<i64: 2>, scalar_prefetch = 0 : i64, scratch_operands = 0 : i64, tpu.core_type = #tpu.core_type<tc>, window_params = [{transform_indices = @transform_0, window_bounds = array<i64: 1, 8, 8, 8>}, {pipeline_mode = #tpu.pipeline_mode<synchronous>, transform_indices = @transform_1, window_bounds = array<i64: 1, 8>}, {pipeline_mode = #tpu.pipeline_mode<synchronous>, transform_indices = @transform_2, window_bounds = array<i64: 1, 8>}, {transform_indices = @transform_3, window_bounds = array<i64: 1, 8, 8, 8>}]} {
    %c0 = arith.constant 0 : index
    %c0_0 = arith.constant 0 : index
    %0 = vector.load %arg2[%c0, %c0_0] : memref<1x8xf32, #tpu.memory_space<vmem>>, vector<1x8xf32>
    %1 = vector.shape_cast %0 : vector<1x8xf32> to vector<1x1x1x8xf32>
    %c0_1 = arith.constant 0 : index
    %c0_2 = arith.constant 0 : index
    %2 = vector.load %arg3[%c0_1, %c0_2] : memref<1x8xf32, #tpu.memory_space<vmem>>, vector<1x8xf32>
    %3 = vector.shape_cast %2 : vector<1x8xf32> to vector<1x1x1x8xf32>
    %c0_3 = arith.constant 0 : index
    %c0_4 = arith.constant 0 : index
    %c0_5 = arith.constant 0 : index
    %c0_6 = arith.constant 0 : index
    %4 = vector.load %arg1[%c0_3, %c0_4, %c0_5, %c0_6] : memref<1x8x8x8xf32, #tpu.memory_space<vmem>>, vector<1x8x8x8xf32>
    %5 = vector.broadcast %1 : vector<1x1x1x8xf32> to vector<1x8x8x8xf32>
    %6 = arith.mulf %4, %5 : vector<1x8x8x8xf32>
    %7 = vector.broadcast %3 : vector<1x1x1x8xf32> to vector<1x8x8x8xf32>
    %8 = arith.addf %6, %7 : vector<1x8x8x8xf32>
    %cst = arith.constant 0.000000e+00 : f32
    %9 = vector.broadcast %cst : f32 to vector<1x8x8x8xf32>
    %10 = arith.maximumf %8, %9 : vector<1x8x8x8xf32>
    %c0_7 = arith.constant 0 : index
    %c0_8 = arith.constant 0 : index
    %c0_9 = arith.constant 0 : index
    %c0_10 = arith.constant 0 : index
    %11 = vector.load %arg4[%c0_7, %c0_8, %c0_9, %c0_10] : memref<1x8x8x8xf32, #tpu.memory_space<vmem>>, vector<1x8x8x8xf32>
    tpu.vector_store %arg4[%c0_7, %c0_8, %c0_9, %c0_10], %10 {strides = array<i32>} : memref<1x8x8x8xf32, #tpu.memory_space<vmem>>, vector<1x8x8x8xf32>,
    return
  }
  func.func @transform_0(%arg0: i32) -> (i32, i32, i32, i32) {
    %c0_i32 = arith.constant 0 : i32
    %c0_i32_0 = arith.constant 0 : i32
    %c0_i32_1 = arith.constant 0 : i32
    %c0_i32_2 = arith.constant 0 : i32
    return %arg0, %c0_i32, %c0_i32_0, %c0_i32_1 : i32, i32, i32, i32
  }
  func.func @transform_1(%arg0: i32) -> (i32, i32) {
    %c0_i32 = arith.constant 0 : i32
    %c0_i32_0 = arith.constant 0 : i32
    %c0_i32_1 = arith.constant 0 : i32
    return %c0_i32, %c0_i32_0 : i32, i32
  }
  func.func @transform_2(%arg0: i32) -> (i32, i32) {
    %c0_i32 = arith.constant 0 : i32
    %c0_i32_0 = arith.constant 0 : i32
    %c0_i32_1 = arith.constant 0 : i32
    return %c0_i32, %c0_i32_0 : i32, i32
  }
  func.func @transform_3(%arg0: i32) -> (i32, i32, i32, i32) {
    %c0_i32 = arith.constant 0 : i32
    %c0_i32_0 = arith.constant 0 : i32
    %c0_i32_1 = arith.constant 0 : i32
    %c0_i32_2 = arith.constant 0 : i32
    return %arg0, %c0_i32, %c0_i32_0, %c0_i32_1 : i32, i32, i32, i32
  }
}

</mosaic_0001>

<bundles_post_ra>
// kernel: down_forward.5
= control target key start
LH: loop header
LB: loop body
LE: loop exit
PB: predicated region body
PF: predicated region fallthrough
CT: control target
= control target key end

     0   :  { %s332_s12 = smov 0   ;;  %s363_s0 = inlined_call_operand.vmem [shape: f32[2,8,8,8], index: 0, kind: input, shape index: {}]   ;;  %s364_s1 = inlined_call_operand.vmem [shape: f32[1,8], index: 1, kind: input, shape index: {}]   ;;  %s365_s2 = inlined_call_operand.vmem [shape: f32[1,8], index: 2, kind: input, shape index: {}]   ;;  %s366_s3 = inlined_call_operand.vmem [shape: f32[2,8,8,8], index: 3, kind: output, shape index: {}]  }
   0x1 LB: > { %s281_s13 = sadd.s32 4294967295, %s310_s12   ;;  %p285_p0 = scmp.ge.s32.totalorder %s310_s12, 1  ;;  %s310_s12 = sphi %s332_s12, %s13_s12  }
   0x2   : > { %p137_p1 = scmp.lt.s32.totalorder %s310_s12, 3 }
   0x4   : > { %p138_p2 = pnand %p285_p0, %p137_p1 }
   0x5   : > { %p161_p3 = scmp.lt.s32.totalorder (!%p138_p2), %s281_s13, 1  ;;  %v290_v0 = vld [vmem:[%s364_s1] ss:$0 sm:$0xff] (!%p138_p2)  ;;  %vm217_vm0 = vcmask (!%p138_p2), 64512  }
   0x6   : > { %141 = sbr.rel (%p138_p2) target bundleno = 27 (0x1b), region = 32  ;;  %v291_v1 = vld [vmem:[%s365_s2] ss:$0 sm:$0xff] (!%p138_p2) }
   0xd   : > { %s368_s13 = smov (!%p161_p3, %s281_s13), 1 }
   0xe   : > { %s294_s14 = sshll.u32 %s368_s13, 6 }
   0xf   : > { %s165_s19 = scalar_lea.vmem %s363_s0, %s294_s14  ;;  %s170_s24 = scalar_lea.vmem %s366_s3, %s294_s14 }
  0x10   : > { %v173_v2 = vld [vmem:[%s165_s19] sm:$0xff]  ;;  %v174_v3 = vld [vmem:[%s165_s19 + $0x8] sm:$0xff]  ;;  %v175_v4 = vld [vmem:[%s165_s19 + $0x10] sm:$0xff] }
  0x11   : > { %v187_v5 = vmul.f32 %v290_v0, %v173_v2  ;;  %v188_v6 = vmul.f32 %v290_v0, %v174_v3  ;;  %v189_v7 = vmul.f32 %v290_v0, %v175_v4  ;;  %v176_v8 = vld [vmem:[%s165_s19 + $0x18] sm:$0xff]  ;;  %v177_v9 = vld [vmem:[%s165_s19 + $0x20] sm:$0xff]  ;;  %v178_v10 = vld [vmem:[%s165_s19 + $0x28] sm:$0xff] }
  0x12   : > { %v190_v11 = vmul.f32 %v290_v0, %v176_v8  ;;  %v191_v12 = vmul.f32 %v290_v0, %v177_v9  ;;  %v192_v13 = vmul.f32 %v290_v0, %v178_v10  ;;  %v179_v14 = vld [vmem:[%s165_s19 + $0x30] sm:$0xff]  ;;  %v180_v15 = vld [vmem:[%s165_s19 + $0x38] sm:$0xff] }
  0x13   : > { %v201_v16 = vadd.f32 %v291_v1, %v187_v5  ;;  %v202_v17 = vadd.f32 %v291_v1, %v188_v6  ;;  %v203_v18 = vadd.f32 %v291_v1, %v189_v7  ;;  %v193_v19 = vmul.f32 %v290_v0, %v179_v14 }
  0x14   : > { %v204_v20 = vadd.f32 %v291_v1, %v190_v11  ;;  %v205_v21 = vadd.f32 %v291_v1, %v191_v12  ;;  %v206_v22 = vadd.f32 %v291_v1, %v192_v13  ;;  %v194_v23 = vmul.f32 %v290_v0, %v180_v15 }
  0x15   : > { %v209_v24 = vmax.f32 %v201_v16, 0.0  ;;  %v210_v25 = vmax.f32 %v202_v17, 0.0  ;;  %v211_v26 = vmax.f32 %v203_v18, 0.0  ;;  %v207_v27 = vadd.f32 %v291_v1, %v193_v19 }
  0x16   : > { %v212_v28 = vmax.f32 %v204_v20, 0.0  ;;  %v213_v29 = vmax.f32 %v205_v21, 0.0  ;;  %v214_v30 = vmax.f32 %v206_v22, 0.0  ;;  %v208_v31 = vadd.f32 %v291_v1, %v194_v23 }
  0x17   : > { %218 = vst.msk [vmem:[%s170_s24] sm:$0xff] %vm217_vm0, %v209_v24  ;;  %219 = vst.msk [vmem:[%s170_s24 + $0x8] sm:$0xff] %vm217_vm0, %v210_v25  ;;  %v215_v32 = vmax.f32 %v207_v27, 0.0 }
  0x18   : > { %220 = vst.msk [vmem:[%s170_s24 + $0x10] sm:$0xff] %vm217_vm0, %v211_v26  ;;  %221 = vst.msk [vmem:[%s170_s24 + $0x18] sm:$0xff] %vm217_vm0, %v212_v28  ;;  %v216_v33 = vmax.f32 %v208_v31, 0.0 }
  0x19   : > { %222 = vst.msk [vmem:[%s170_s24 + $0x20] sm:$0xff] %vm217_vm0, %v213_v29  ;;  %223 = vst.msk [vmem:[%s170_s24 + $0x28] sm:$0xff] %vm217_vm0, %v214_v30 }
  0x1a   : > { %224 = vst.msk [vmem:[%s170_s24 + $0x30] sm:$0xff] %vm217_vm0, %v215_v32  ;;  %225 = vst.msk [vmem:[%s170_s24 + $0x38] sm:$0xff] %vm217_vm0, %v216_v33 }
  0x1b PF: > { %s13_s12 = sadd.s32 1, %s310_s12  }
  0x1c   : > { %p10_p4 = scmp.ge.s32.totalorder %s13_s12, 4  }
  0x1e   :  { %12 = sbr.rel (!%p10_p4) target bundleno = 1 (0x1), region = 62 }

// kernel: down_forward.4
= control target key start
LH: loop header
LB: loop body
LE: loop exit
PB: predicated region body
PF: predicated region fallthrough
CT: control target
= control target key end

     0   :  { %s1169_s21 = smov 0   ;;  %s1588_s0 = inlined_call_operand.vmem [shape: f32[2,8,8,8], index: 0, kind: input, shape index: {}]   ;;  %s1589_s1 = inlined_call_operand.vmem [shape: f32[1,8], index: 1, kind: input, shape index: {}]   ;;  %s1590_s2 = inlined_call_operand.vmem [shape: f32[1,8], index: 2, kind: input, shape index: {}]   ;;  %s1591_s3 = inlined_call_operand.vmem [shape: f32[72,8], index: 3, kind: input, shape index: {}]   ;;  %s1592_s4 = inlined_call_operand.vmem [shape: f32[2,8,8,8], index: 4, kind: output, shape index: {0}]   ;;  %s1593_s5 = inlined_call_operand.vmem [shape: f32[2,1,8], index: 5, kind: output, shape index: {1}]   ;;  %s1594_s6 = inlined_call_operand.vmem [shape: f32[2,1,8], index: 6, kind: output, shape index: {2}]  }
   0x1 LB: > { %s1004_s22 = sadd.s32 4294967295, %s1123_s21   ;;  %p1008_p0 = scmp.ge.s32.totalorder %s1123_s21, 1  ;;  %s1123_s21 = sphi %s1169_s21, %s17_s21  }
   0x2   : > { %p217_p1 = scmp.lt.s32.totalorder %s1123_s21, 3 }
   0x4   : > { %p218_p2 = pnand %p1008_p0, %p217_p1 }
   0x5   : > { %vm342_vm0 = vcmask (!%p218_p2), 1040384   ;;  %v1125_v0 = vmov (!%p218_p2), 0.0   ;;  %p253_p3 = scmp.lt.s32.totalorder (!%p218_p2), %s1004_s22, 1  ;;  %vm426_vm1 = vcmask (!%p218_p2), 1045504   ;;  %vm377_vm2 = vcmask (!%p218_p2), 1046528   ;;  %s1126_s7 = smov (!%p218_p2), 16  }
   0x6   : > { %221 = sbr.rel (%p218_p2) target bundleno = 496 (0x1f0), region = 36  ;;  %v324_v1 = vrot.slane (!%p218_p2), %v1125_v0, 7  ;;  %v1189_v8 = vld [vmem:[%s1589_s1] ss:$0 sm:$0xff] (!%p218_p2)  ;;  %s1127_s8 = smov (!%p218_p2), 8   ;;  %vm627_vm3 = vcmask (!%p218_p2), 64512  }
   0x7   : > { %v1207_v11 = vld [vmem:[%s1590_s2] ss:$0 sm:$0xff] (!%p218_p2)  ;;  %s1128_s9 = smov (!%p218_p2), 24   ;;  %s1129_s10 = smov (!%p218_p2), 32   ;;  %vm636_vm4 = vcmask (!%p218_p2), 130048   ;;  %vm645_vm5 = vcmask (!%p218_p2), 195584  }
   0x8   : > { %v1178_v2 = vsel (!%p218_p2), %vm342_vm0, 0.0, %v324_v1  ;;  %v352_v3 = vsel (!%p218_p2), %vm342_vm0, %v324_v1, 0.0  ;;  %s1130_s11 = smov (!%p218_p2), 40   ;;  %s1131_s27 = smov (!%p218_p2), 48   ;;  %vm654_vm6 = vcmask (!%p218_p2), 261120   ;;  %vm663_vm7 = vcmask (!%p218_p2), 326656  }
   0x9   : > { %v427_v4 = vrot.slane (!%p218_p2), %v1178_v2, 2  ;;  %v428_v5 = vrot.slane (!%p218_p2), %v352_v3, 2  ;;  %v378_v6 = vrot.slane (!%p218_p2), %v1178_v2, 1  ;;  %v379_v7 = vrot.slane (!%p218_p2), %v352_v3, 1  ;;  %s1132_s13 = smov (!%p218_p2), 56   ;;  %s1133_s16 = smov (!%p218_p2), 64  }
   0xa   : > { %vm672_vm8 = vcmask (!%p218_p2), 392192   ;;  %vm681_vm9 = vcmask (!%p218_p2), 457728   ;;  %vm690_vm10 = vcmask (!%p218_p2), 523264   ;;  %vm708_vm11 = vcmask (!%p218_p2), 588800  }
   0xb   : > { %v1192_v9 = vsel (!%p218_p2), %vm426_vm1, %v427_v4, %v428_v5  ;;  %v1195_v10 = vsel (!%p218_p2), %vm377_vm2, %v378_v6, %v379_v7  ;;  %vm867_vm12 = vcmask (!%p218_p2), 57344  }
   0xc   : > { %451 = vrot.lane.b32.xlu1 (!%p218_p2), %v1192_v9, %s1126_s7  ;;  %402 = vrot.lane.b32.xlu0 (!%p218_p2), %v1195_v10, %s1127_s8 }
   0xd   : > { %s1596_s22 = smov (!%p253_p3, %s1004_s22), 1 }
   0xe   : > { %s1025_s23 = sshll.u32 %s1596_s22, 6  ;;  %s268_s19 = scalar_lea.vmem %s1594_s6, %s1596_s22 }
   0xf   : > { %s1202_s28 = scalar_lea.vmem %s1588_s0, %s1025_s23 }
  0x10   : > { %v272_v12 = vld [vmem:[%s1202_s28 + $0x8] sm:$0xff]  ;;  %v271_v13 = vld [vmem:[%s1202_s28] sm:$0xff]  ;;  %v273_v16 = vld [vmem:[%s1202_s28 + $0x10] sm:$0xff] }
  0x11   : > { %v286_v14 = vmul.f32 %v1189_v8, %v272_v12  ;;  %v285_v15 = vmul.f32 %v1189_v8, %v271_v13  ;;  %v287_v17 = vmul.f32 %v1189_v8, %v273_v16  ;;  %v276_v18 = vld [vmem:[%s1202_s28 + $0x28] sm:$0xff]  ;;  %v277_v19 = vld [vmem:[%s1202_s28 + $0x30] sm:$0xff]  ;;  %v278_v20 = vld [vmem:[%s1202_s28 + $0x38] sm:$0xff] }
  0x12   : > { %v290_v23 = vmul.f32 %v1189_v8, %v276_v18  ;;  %v291_v24 = vmul.f32 %v1189_v8, %v277_v19  ;;  %v292_v26 = vmul.f32 %v1189_v8, %v278_v20  ;;  %v274_v58 = vld [vmem:[%s1202_s28 + $0x18] sm:$0xff] }
  0x13   : > { %v300_v21 = vadd.f32 %v1207_v11, %v286_v14  ;;  %v299_v22 = vadd.f32 %v1207_v11, %v285_v15  ;;  %v301_v25 = vadd.f32 %v1207_v11, %v287_v17  ;;  %v288_v62 = vmul.f32 %v1189_v8, %v274_v58 }
  0x14   : > { %v304_v29 = vadd.f32 %v1207_v11, %v290_v23  ;;  %v305_v30 = vadd.f32 %v1207_v11, %v291_v24  ;;  %v306_v32 = vadd.f32 %v1207_v11, %v292_v26 }
  0x15   : > { %v308_v27 = vmax.f32 %v300_v21, 0.0  ;;  %v307_v28 = vmax.f32 %v299_v22, 0.0  ;;  %v309_v31 = vmax.f32 %v301_v25, 0.0  ;;  %v699_v21 = vld [vmem:[%s1591_s3] sm:$0xff]  ;;  %v700_v22 = vld [vmem:[%s1591_s3 + $0x8] sm:$0xff] }
  0x16   : > { %v312_v50 = vmax.f32 %v304_v29, 0.0  ;;  %v313_v51 = vmax.f32 %v305_v30, 0.0  ;;  %v314_v55 = vmax.f32 %v306_v32, 0.0  ;;  %v701_v30 = vld [vmem:[%s1591_s3 + $0x10] sm:$0xff] }
  0x17   : > { %v326_v33 = vrot.slane %v308_v27, 7  ;;  %v325_v34 = vrot.slane %v307_v28, 7  ;;  %v327_v35 = vrot.slane %v309_v31, 7  ;;  %v702_v31 = vld [vmem:[%s1591_s3 + $0x18] sm:$0xff] }
  0x18   : > { %v330_v59 = vrot.slane %v312_v50, 7  ;;  %v331_v60 = vrot.slane %v313_v51, 7  ;;  %v332_v63 = vrot.slane %v314_v55, 7  ;;  %v706_v50 = vld [vmem:[%s1591_s3 + $0x38] sm:$0xff] }
  0x19   : > { %v1232_v36 = vsel %vm342_vm0, 0.0, %v326_v33  ;;  %v1235_v37 = vsel %vm342_vm0, 0.0, %v325_v34  ;;  %v353_v38 = vsel %vm342_vm0, %v325_v34, 0.0  ;;  %v354_v39 = vsel %vm342_vm0, %v326_v33, 0.0 }
  0x1a   : > { %478 = vrot.lane.b32.xlu1 %v1232_v36, %s1128_s9  ;;  %476 = vrot.lane.b32.xlu0 %v1235_v37, %s1128_s9  ;;  %v430_v40 = vrot.slane %v1235_v37, 2  ;;  %v431_v41 = vrot.slane %v353_v38, 2  ;;  %v381_v42 = vrot.slane %v1235_v37, 1  ;;  %v382_v43 = vrot.slane %v353_v38, 1 }
  0x1b   : > { %v384_v44 = vrot.slane %v1232_v36, 1  ;;  %v385_v45 = vrot.slane %v354_v39, 1  ;;  %v1249_v48 = vsel %vm342_vm0, 0.0, %v327_v35  ;;  %v1252_v49 = vsel %vm342_vm0, %v327_v35, 0.0 }
  0x1c   : > { %v432_v46 = vsel %vm426_vm1, %v430_v40, %v431_v41  ;;  %v383_v47 = vsel %vm377_vm2, %v381_v42, %v382_v43  ;;  %v433_v53 = vrot.slane %v1232_v36, 2  ;;  %v434_v54 = vrot.slane %v354_v39, 2  ;;  %v275_v41 = vld [vmem:[%s1202_s28 + $0x20] sm:$0xff]  ;;  %v704_v43 = vld [vmem:[%s1591_s3 + $0x28] sm:$0xff] }
  0x1d   : > { %v1257_v52 = vsel %vm377_vm2, %v384_v44, %v385_v45  ;;  %v387_v56 = vrot.slane %v1249_v48, 1  ;;  %v388_v57 = vrot.slane %v1252_v49, 1  ;;  %v1274_v1 = vsel %vm342_vm0, 0.0, %v330_v59  ;;  %v703_v42 = vld [vmem:[%s1591_s3 + $0x20] sm:$0xff] }
  0x1e   : > { %453 = vrot.lane.b32.xlu1 %v432_v46, %s1126_s7  ;;  %404 = vrot.lane.b32.xlu0 %v383_v47, %s1127_s8  ;;  %v1267_v61 = vsel %vm426_vm1, %v433_v53, %v434_v54  ;;  %v358_v3 = vsel %vm342_vm0, %v330_v59, 0.0  ;;  %v1278_v4 = vsel %vm342_vm0, 0.0, %v331_v60  ;;  %v396_v5 = vrot.slane %v1274_v1, 1 }
  0x1f   : > { %v1271_v0 = vsel %vm377_vm2, %v387_v56, %v388_v57  ;;  %v397_v6 = vrot.slane %v358_v3, 1  ;;  %v445_v7 = vrot.slane %v1274_v1, 2  ;;  %v446_v12 = vrot.slane %v358_v3, 2 }
  0x20   : > { %v359_v13 = vsel %vm342_vm0, %v331_v60, 0.0  ;;  %v399_v14 = vrot.slane %v1278_v4, 1  ;;  %v448_v15 = vrot.slane %v1278_v4, 2  ;;  %v1289_v16 = vsel %vm342_vm0, 0.0, %v332_v63 }
  0x21   : > { %v1292_v17 = vsel %vm377_vm2, %v396_v5, %v397_v6  ;;  %v1295_v18 = vsel %vm426_vm1, %v445_v7, %v446_v12  ;;  %v400_v19 = vrot.slane %v359_v13, 1  ;;  %v449_v20 = vrot.slane %v359_v13, 2 }
  0x22   : > { %406 = vrot.lane.b32.xlu1 %v1257_v52, %s1127_s8  ;;  %504 = vrot.lane.b32.xlu0 %v383_v47, %s1129_s10  ;;  %v360_v23 = vsel %vm342_vm0, %v332_v63, 0.0  ;;  %v501_v24 = vrot.slane %v1289_v16, 1  ;;  %v528_v25 = vrot.slane %v1289_v16, 2  ;;  %v436_v32 = vrot.slane %v1249_v48, 2 }
  0x23   : > { %v1307_v26 = vsel %vm377_vm2, %v399_v14, %v400_v19  ;;  %v1310_v27 = vsel %vm426_vm1, %v448_v15, %v449_v20  ;;  %v502_v28 = vrot.slane %v360_v23, 1  ;;  %v529_v29 = vrot.slane %v360_v23, 2 }
  0x24   : > { %v302_v33 = vadd.f32 %v1207_v11, %v288_v62  ;;  %v1074_v34 = vpack.c.bf16 %v700_v22, %v699_v21  ;;  %v437_v35 = vrot.slane %v1252_v49, 2  ;;  %v1078_v40 = vpack.c.bf16 %v702_v31, %v701_v30  ;;  %v705_v49 = vld [vmem:[%s1591_s3 + $0x30] sm:$0xff] }
  0x25   : > { %v1326_v38 = vsel %vm377_vm2, %v501_v24, %v502_v28  ;;  %v1329_v39 = vsel %vm426_vm1, %v528_v25, %v529_v29  ;;  %v289_v47 = vmul.f32 %v1189_v8, %v275_v41  ;;  %v1086_v53 = vpack.c.bf16 %v706_v50, %v705_v49 }
  0x26   : > { %531 = vrot.lane.b32.xlu1 %v432_v46, %s1130_s11  ;;  %506 = vrot.lane.b32.xlu0 %v1257_v52, %s1129_s10  ;;  %v438_v44 = vsel %vm426_vm1, %v436_v32, %v437_v35  ;;  %v310_v45 = vmax.f32 %v302_v33, 0.0  ;;  %v1082_v46 = vpack.c.bf16 %v704_v43, %v703_v42 }
  0x27   : > { %1075 = vmatprep.subr.bf16.mxu0 %v1074_v34  ;;  %1090 = vmatprep.subr.bf16.mxu1 %v1074_v34  ;;  %v303_v8 = vadd.f32 %v1207_v11, %v289_v47  ;;  %v707_v11 = vld [vmem:[%s1591_s3 + $0x40] sm:$0xff] }
  0x28   : > { %1077 = vmatpush3.bf16.msra.mxu0 %v1074_v34  ;;  %1095 = vmatpush3.bf16.msra.mxu1 %v1074_v34  ;;  %v328_v51 = vrot.slane %v310_v45, 7 }
  0x29   : > { %1079 = vmatprep.subr.bf16.mxu0 %v1078_v40  ;;  %1091 = vmatprep.subr.bf16.mxu1 %v1078_v40  ;;  %v311_v56 = vmax.f32 %v303_v8, 0.0 }
  0x2a   : > { %455 = vrot.lane.b32.xlu1 %v1267_v61, %s1126_s7  ;;  %408 = vrot.lane.b32.xlu0 %v1271_v0, %s1127_s8  ;;  %v1359_v54 = vsel %vm342_vm0, 0.0, %v328_v51  ;;  %v356_v55 = vsel %vm342_vm0, %v328_v51, 0.0 }
  0x2b   : > { %v391_v57 = vrot.slane %v356_v55, 1  ;;  %v329_v58 = vrot.slane %v311_v56, 7  ;;  %v439_v63 = vrot.slane %v1359_v54, 2  ;;  %v440_v3 = vrot.slane %v356_v55, 2 }
  0x2c   : > { %1081 = vmatpush3.bf16.msra.mxu0 %v1078_v40  ;;  %1096 = vmatpush3.bf16.msra.mxu1 %v1078_v40 }
  0x2d   : > { %1083 = vmatprep.subr.bf16.mxu0 %v1082_v46  ;;  %1092 = vmatprep.subr.bf16.mxu1 %v1082_v46  ;;  %v1376_v60 = vsel %vm342_vm0, 0.0, %v329_v58  ;;  %v357_v62 = vsel %vm342_vm0, %v329_v58, 0.0 }
  0x2e   : > { %555 = vrot.lane.b32.xlu1 %v1232_v36, %s1131_s27  ;;  %533 = vrot.lane.b32.xlu0 %v1267_v61, %s1130_s11  ;;  %v393_v5 = vrot.slane %v1376_v60, 1  ;;  %v442_v7 = vrot.slane %v1376_v60, 2  ;;  %v443_v12 = vrot.slane %v357_v62, 2 }
  0x30   : > { %1085 = vmatpush3.bf16.msra.mxu0 %v1082_v46  ;;  %1097 = vmatpush3.bf16.msra.mxu1 %v1082_v46  ;;  %v444_v13 = vsel %vm426_vm1, %v442_v7, %v443_v12 }
  0x31   : > { %1087 = vmatprep.subr.bf16.mxu0 %v1086_v53  ;;  %1093 = vmatprep.subr.bf16.mxu1 %v1086_v53 }
  0x32   : > { %480 = vrot.lane.b32.xlu1 %v1249_v48, %s1128_s9  ;;  %457 = vrot.lane.b32.xlu0 %v438_v44, %s1126_s7 }
  0x34   : > { %1089 = vmatpush3.bf16.msra.mxu0 %v1086_v53  ;;  %1098 = vmatpush3.bf16.msra.mxu1 %v1086_v53 }
  0x35   : > { %1060 = vmatprep.subr.mxu0 %v707_v11  ;;  %1094 = vmatprep.subr.mxu1 %v707_v11 }
  0x36   : > { %579 = vrot.lane.b32.xlu1 %v1257_v52, %s1132_s13  ;;  %557 = vrot.lane.b32.xlu0 %v1249_v48, %s1131_s27  ;;  %v390_v52 = vrot.slane %v1359_v54, 1 }
  0x38   : > { %1061 = vmatpush3.msra.mxu0 %v707_v11  ;;  %1099 = vmatpush3.msra.mxu1 %v707_v11  ;;  %v392_v59 = vsel %vm377_vm2, %v390_v52, %v391_v57 }
  0x3a   : > { %508 = vrot.lane.b32.xlu1 %v1271_v0, %s1129_s10  ;;  %482 = vrot.lane.b32.xlu0 %v1359_v54, %s1128_s9 }
  0x3e   : > { %603 = vrot.lane.b32.xlu1 %v1267_v61, %s1133_s16  ;;  %581 = vrot.lane.b32.xlu0 %v1271_v0, %s1132_s13  ;;  %v394_v61 = vrot.slane %v357_v62, 1  ;;  %v441_v0 = vsel %vm426_vm1, %v439_v63, %v440_v3 }
  0x40   : > { %v395_v6 = vsel %vm377_vm2, %v393_v5, %v394_v61 }
  0x42   : > { %510 = vrot.lane.b32.xlu1 %v392_v59, %s1129_s10  ;;  %410 = vrot.lane.b32.xlu0 %v392_v59, %s1127_s8 }
  0x46   : > { %605 = vrot.lane.b32.xlu1 %v438_v44, %s1133_s16  ;;  %535 = vrot.lane.b32.xlu0 %v438_v44, %s1130_s11 }
  0x4a   : > { %459 = vrot.lane.b32.xlu1 %v441_v0, %s1126_s7  ;;  %412 = vrot.lane.b32.xlu0 %v395_v6, %s1127_s8 }
  0x4e   : > { %559 = vrot.lane.b32.xlu1 %v1359_v54, %s1131_s27  ;;  %537 = vrot.lane.b32.xlu0 %v441_v0, %s1130_s11 }
  0x52   : > { %484 = vrot.lane.b32.xlu1 %v1376_v60, %s1128_s9  ;;  %461 = vrot.lane.b32.xlu0 %v444_v13, %s1126_s7 }
  0x56   : > { %583 = vrot.lane.b32.xlu1 %v392_v59, %s1132_s13  ;;  %561 = vrot.lane.b32.xlu0 %v1376_v60, %s1131_s27 }
  0x5a   : > { %512 = vrot.lane.b32.xlu1 %v395_v6, %s1129_s10  ;;  %486 = vrot.lane.b32.xlu0 %v1274_v1, %s1128_s9 }
  0x5e   : > { %607 = vrot.lane.b32.xlu1 %v441_v0, %s1133_s16  ;;  %585 = vrot.lane.b32.xlu0 %v395_v6, %s1132_s13 }
  0x62   : > { %514 = vrot.lane.b32.xlu1 %v1292_v17, %s1129_s10  ;;  %414 = vrot.lane.b32.xlu0 %v1292_v17, %s1127_s8 }
  0x66   : > { %609 = vrot.lane.b32.xlu1 %v444_v13, %s1133_s16  ;;  %539 = vrot.lane.b32.xlu0 %v444_v13, %s1130_s11 }
  0x6a   : > { %463 = vrot.lane.b32.xlu1 %v1295_v18, %s1126_s7  ;;  %416 = vrot.lane.b32.xlu0 %v1307_v26, %s1127_s8 }
  0x6e   : > { %563 = vrot.lane.b32.xlu1 %v1274_v1, %s1131_s27  ;;  %541 = vrot.lane.b32.xlu0 %v1295_v18, %s1130_s11 }
  0x72   : > { %488 = vrot.lane.b32.xlu1 %v1278_v4, %s1128_s9  ;;  %465 = vrot.lane.b32.xlu0 %v1310_v27, %s1126_s7 }
  0x76   : > { %587 = vrot.lane.b32.xlu1 %v1292_v17, %s1132_s13  ;;  %565 = vrot.lane.b32.xlu0 %v1278_v4, %s1131_s27 }
  0x7a   : > { %516 = vrot.lane.b32.xlu1 %v1307_v26, %s1129_s10  ;;  %490 = vrot.lane.b32.xlu0 %v1289_v16, %s1128_s9  ;;  %s1543_s9 = scalar_lea.vmem %s1592_s4, %s1025_s23 }
  0x7e   : > { %611 = vrot.lane.b32.xlu1 %v1295_v18, %s1133_s16  ;;  %589 = vrot.lane.b32.xlu0 %v1307_v26, %s1132_s13  ;;  %v452_v14 = vpop.permute.xlu1 %451  ;;  %v403_v15 = vpop.permute.xlu0 %402 }
  0x7f   : > { %v628_v29 = vsel %vm627_vm3, %v1178_v2, %v403_v15 }
  0x80   : > { %v637_v31 = vsel %vm636_vm4, %v628_v29, %v452_v14 }
  0x82   : > { %543 = vrot.lane.b32.xlu1 %v1310_v27, %s1130_s11  ;;  %518 = vrot.lane.b32.xlu0 %v1326_v38, %s1129_s10 }
  0x86   : > { %545 = vrot.lane.b32.xlu1 %v1329_v39, %s1130_s11  ;;  %613 = vrot.lane.b32.xlu0 %v1310_v27, %s1133_s16  ;;  %s265_s11 = scalar_lea.vmem %s1593_s5, %s1596_s22 }
  0x8a   : > { %569 = vrot.lane.b32.xlu1 %v1178_v2, %s1131_s27  ;;  %567 = vrot.lane.b32.xlu0 %v1289_v16, %s1131_s27 }
  0x8c   : > { %v479_v17 = vpop.permute.xlu1 %478  ;;  %v477_v18 = vpop.permute.xlu0 %476 }
  0x8d   : > { %v646_v32 = vsel %vm645_vm5, %v637_v31, %v477_v18 }
  0x8e   : > { %593 = vrot.lane.b32.xlu1 %v1195_v10, %s1132_s13  ;;  %591 = vrot.lane.b32.xlu0 %v1326_v38, %s1132_s13 }
  0x90   : > { %v454_v19 = vpop.permute.xlu1 %453  ;;  %v405_v20 = vpop.permute.xlu0 %404 }
  0x91   : > { %v629_v38 = vsel %vm627_vm3, %v1235_v37, %v405_v20 }
  0x92   : > { %617 = vrot.lane.b32.xlu1 %v1192_v9, %s1133_s16  ;;  %615 = vrot.lane.b32.xlu0 %v1329_v39, %s1133_s16  ;;  %v638_v43 = vsel %vm636_vm4, %v629_v38, %v454_v19 }
  0x93   : > { %v647_v45 = vsel %vm645_vm5, %v638_v43, %v479_v17 }
  0x94   : > { %v407_v21 = vpop.permute.xlu1 %406  ;;  %v505_v22 = vpop.permute.xlu0 %504 }
  0x95   : > { %v655_v35 = vsel %vm654_vm6, %v646_v32, %v505_v22  ;;  %v630_v3 = vsel %vm627_vm3, %v1232_v36, %v407_v21 }
  0x98   : > { %v532_v23 = vpop.permute.xlu1 %531  ;;  %v507_v16 = vpop.permute.xlu0 %506 }
  0x99   : > { %v664_v2 = vsel %vm663_vm7, %v655_v35, %v532_v23  ;;  %v656_v47 = vsel %vm654_vm6, %v647_v45, %v507_v16 }
  0x9c   : > { %v456_v24 = vpop.permute.xlu1 %455  ;;  %v1455_v25 = vpop.permute.xlu0 %408 }
  0x9d   : > { %v639_v5 = vsel %vm636_vm4, %v630_v3, %v456_v24  ;;  %v631_v36 = vsel %vm627_vm3, %v1249_v48, %v1455_v25 }
  0xa0   : > { %v556_v26 = vpop.permute.xlu1 %555  ;;  %v534_v10 = vpop.permute.xlu0 %533 }
  0xa1   : > { %v673_v39 = vsel %vm672_vm8, %v664_v2, %v556_v26  ;;  %v665_v49 = vsel %vm663_vm7, %v656_v47, %v534_v10 }
  0xa4   : > { %v481_v27 = vpop.permute.xlu1 %480  ;;  %v458_v28 = vpop.permute.xlu0 %457 }
  0xa5   : > { %v648_v61 = vsel %vm645_vm5, %v639_v5, %v481_v27  ;;  %v640_v19 = vsel %vm636_vm4, %v631_v36, %v458_v28 }
  0xa8   : > { %v580_v9 = vpop.permute.xlu1 %579  ;;  %v558_v30 = vpop.permute.xlu0 %557 }
  0xa9   : > { %v682_v40 = vsel %vm681_vm9, %v673_v39, %v580_v9  ;;  %v674_v50 = vsel %vm672_vm8, %v665_v49, %v558_v30 }
  0xac   : > { %v509_v33 = vpop.permute.xlu1 %508  ;;  %v483_v34 = vpop.permute.xlu0 %482 }
  0xad   : > { %v657_v7 = vsel %vm654_vm6, %v648_v61, %v509_v33  ;;  %v649_v20 = vsel %vm645_vm5, %v640_v19, %v483_v34 }
  0xb0   : > { %v604_v41 = vpop.permute.xlu1 %603  ;;  %v582_v42 = vpop.permute.xlu0 %581 }
  0xb1   : > { %v691_v44 = vsel %vm690_vm10, %v682_v40, %v604_v41  ;;  %v683_v51 = vsel %vm681_vm9, %v674_v50, %v582_v42 }
  0xb2   : > { %1062 = vmatprep.mubr.msk.f32.mxu0 %vm708_vm11, %v691_v44 }
  0xb4   : > { %v511_v46 = vpop.permute.xlu1 %510  ;;  %v411_v37 = vpop.permute.xlu0 %410 }
  0xb5   : > { %v658_v23 = vsel %vm654_vm6, %v649_v20, %v511_v46  ;;  %v632_v34 = vsel %vm627_vm3, %v1359_v54, %v411_v37 }
  0xb8   : > { %v606_v53 = vpop.permute.xlu1 %605  ;;  %v536_v8 = vpop.permute.xlu0 %535 }
  0xb9   : > { %v692_v55 = vsel %vm690_vm10, %v683_v51, %v606_v53  ;;  %v666_v12 = vsel %vm663_vm7, %v657_v7, %v536_v8 }
  0xba   : > { %1063 = vmatmul.mubr.msk.f32.vlgmr.msra.gmra.mrb[0].mxu0 %vm708_vm11, %v692_v55 }
  0xbc   : > { %v460_v56 = vpop.permute.xlu1 %459  ;;  %v413_v11 = vpop.permute.xlu0 %412 }
  0xbd   : > { %v641_v35 = vsel %vm636_vm4, %v632_v34, %v460_v56  ;;  %v633_v54 = vsel %vm627_vm3, %v1376_v60, %v413_v11 }
  0xc0   : > { %v560_v52 = vpop.permute.xlu1 %559  ;;  %v538_v57 = vpop.permute.xlu0 %537 }
  0xc1   : > { %v675_v13 = vsel %vm672_vm8, %v666_v12, %v560_v52  ;;  %v667_v16 = vsel %vm663_vm7, %v658_v23, %v538_v57 }
  0xc4   : > { %v485_v58 = vpop.permute.xlu1 %484  ;;  %v462_v59 = vpop.permute.xlu0 %461 }
  0xc5   : > { %v650_v38 = vsel %vm645_vm5, %v641_v35, %v485_v58  ;;  %v642_v37 = vsel %vm636_vm4, %v633_v54, %v462_v59 }
  0xc8   : > { %v584_v62 = vpop.permute.xlu1 %583  ;;  %v562_v63 = vpop.permute.xlu0 %561 }
  0xc9   : > { %v684_v14 = vsel %vm681_vm9, %v675_v13, %v584_v62  ;;  %v676_v24 = vsel %vm672_vm8, %v667_v16, %v562_v63 }
  0xcc   : > { %v513_v0 = vpop.permute.xlu1 %512  ;;  %v487_v6 = vpop.permute.xlu0 %486 }
  0xcd   : > { %v659_v40 = vsel %vm654_vm6, %v650_v38, %v513_v0  ;;  %v651_v47 = vsel %vm645_vm5, %v642_v37, %v487_v6 }
  0xd0   : > { %v608_v15 = vpop.permute.xlu1 %607  ;;  %v586_v17 = vpop.permute.xlu0 %585 }
  0xd1   : > { %v693_v18 = vsel %vm690_vm10, %v684_v14, %v608_v15  ;;  %v685_v26 = vsel %vm681_vm9, %v676_v24, %v586_v17 }
  0xd2   : > { %1065 = vmatprep.mubr.msk.f32.mxu0 %vm708_vm11, %v693_v18 }
  0xd4   : > { %v515_v21 = vpop.permute.xlu1 %514  ;;  %v415_v22 = vpop.permute.xlu0 %414 }
  0xd5   : > { %v660_v51 = vsel %vm654_vm6, %v651_v47, %v515_v21  ;;  %v634_v58 = vsel %vm627_vm3, %v1274_v1, %v415_v22 }
  0xd8   : > { %v610_v10 = vpop.permute.xlu1 %609  ;;  %v540_v27 = vpop.permute.xlu0 %539 }
  0xd9   : > { %v694_v48 = vsel %vm690_vm10, %v685_v26, %v610_v10  ;;  %v668_v41 = vsel %vm663_vm7, %v659_v40, %v540_v27 }
  0xda   : > { %1066 = vmatmul.mubr.msk.f32.gmra.mrb[2].mxu0 %vm708_vm11, %v694_v48 }
  0xdc   : > { %v464_v25 = vpop.permute.xlu1 %463  ;;  %v417_v28 = vpop.permute.xlu0 %416 }
  0xdd   : > { %v635_v59 = vsel %vm627_vm3, %v1278_v4, %v417_v28  ;;  %v643_v62 = vsel %vm636_vm4, %v634_v58, %v464_v25 }
  0xe0   : > { %v564_v29 = vpop.permute.xlu1 %563  ;;  %v542_v9 = vpop.permute.xlu0 %541 }
  0xe1   : > { %v677_v42 = vsel %vm672_vm8, %v668_v41, %v564_v29  ;;  %v669_v53 = vsel %vm663_vm7, %v660_v51, %v542_v9 }
  0xe4   : > { %v489_v30 = vpop.permute.xlu1 %488  ;;  %v466_v31 = vpop.permute.xlu0 %465 }
  0xe5   : > { %v644_v63 = vsel %vm636_vm4, %v635_v59, %v466_v31  ;;  %v652_v3 = vsel %vm645_vm5, %v643_v62, %v489_v30 }
  0xe8   : > { %v588_v32 = vpop.permute.xlu1 %587  ;;  %v566_v33 = vpop.permute.xlu0 %565 }
  0xe9   : > { %v686_v43 = vsel %vm681_vm9, %v677_v42, %v588_v32  ;;  %v678_v8 = vsel %vm672_vm8, %v669_v53, %v566_v33 }
  0xec   : > { %v517_v2 = vpop.permute.xlu1 %516  ;;  %v491_v39 = vpop.permute.xlu0 %490 }
  0xed   : > { %v653_v5 = vsel %vm645_vm5, %v644_v63, %v491_v39  ;;  %v661_v6 = vsel %vm654_vm6, %v652_v3, %v517_v2 }
  0xf0   : > { %v612_v44 = vpop.permute.xlu1 %611  ;;  %v590_v45 = vpop.permute.xlu0 %589 }
  0xf1   : > { %v695_v46 = vsel %vm690_vm10, %v686_v43, %v612_v44  ;;  %v687_v55 = vsel %vm681_vm9, %v678_v8, %v590_v45 }
  0xf2   : > { %1068 = vmatprep.mubr.msk.f32.mxu1 %vm708_vm11, %v695_v46 }
  0xf4   : > { %v544_v49 = vpop.permute.xlu1 %543  ;;  %v519_v50 = vpop.permute.xlu0 %518 }
  0xf5   : > { %v662_v7 = vsel %vm654_vm6, %v653_v5, %v519_v50  ;;  %v670_v1 = vsel %vm663_vm7, %v661_v6, %v544_v49 }
  0xf8   : > { %v546_v56 = vpop.permute.xlu1 %545  ;;  %v614_v52 = vpop.permute.xlu0 %613 }
  0xf9   : > { %v696_v60 = vsel %vm690_vm10, %v687_v55, %v614_v52  ;;  %v671_v12 = vsel %vm663_vm7, %v662_v7, %v546_v56 }
  0xfa   : > { %1069 = vmatmul.mubr.msk.f32.vlgmr.msra.gmra.mrb[0].mxu1 %vm708_vm11, %v696_v60 }
  0xfc   : > { %v570_v11 = vpop.permute.xlu1 %569  ;;  %v568_v57 = vpop.permute.xlu0 %567 }
  0xfd   : > { %v680_v4 = vsel %vm672_vm8, %v671_v12, %v570_v11  ;;  %v679_v13 = vsel %vm672_vm8, %v670_v1, %v568_v57 }
 0x100   : > { %v594_v61 = vpop.permute.xlu1 %593  ;;  %v592_v0 = vpop.permute.xlu0 %591 }
 0x101   : > { %v689_v14 = vsel %vm681_vm9, %v680_v4, %v594_v61  ;;  %v688_v15 = vsel %vm681_vm9, %v679_v13, %v592_v0 }
 0x104   : > { %v618_v17 = vpop.permute.xlu1 %617  ;;  %v616_v18 = vpop.permute.xlu0 %615 }
 0x105   : > { %v698_v36 = vsel %vm690_vm10, %v689_v14, %v618_v17  ;;  %v697_v19 = vsel %vm690_vm10, %v688_v15, %v616_v18 }
 0x106   : > { %1071 = vmatprep.mubr.msk.f32.mxu1 %vm708_vm11, %v697_v19 }
 0x107   : > { %1072 = vmatmul.mubr.msk.f32.gmra.mrb[2].mxu1 %vm708_vm11, %v698_v36 }
 0x18d   : > { %v1064_v20 = vpop.f32.mrb[0].mxu0 }
 0x18e   : > { %839 = vst.msk [vmem:[%s1543_s9 + $0x8] sm:$0xff] %vm627_vm3, %v1064_v20  ;;  %v847_v21 = vsel %vm627_vm3, %v1064_v20, 0.0  ;;  %v870_v22 = vmul.f32 %v1064_v20, %v1064_v20  ;;  %v799_v23 = vpop.f32.mrb[1].mxu0 }
 0x18f   : > { %838 = vst.msk [vmem:[%s1543_s9] sm:$0xff] %vm627_vm3, %v799_v23  ;;  %v846_v16 = vsel %vm627_vm3, %v799_v23, 0.0  ;;  %v869_v24 = vmul.f32 %v799_v23, %v799_v23 }
 0x190   : > { %v878_v26 = vsel %vm627_vm3, %v870_v22, 0.0  ;;  %v848_v10 = vadd.f32 %v847_v21, %v846_v16 }
 0x191   : > { %v877_v27 = vsel %vm627_vm3, %v869_v24, 0.0 }
 0x192   : > { %v879_v48 = vadd.f32 %v878_v26, %v877_v27 }
 0x1ad   : > { %v1067_v25 = vpop.f32.mrb[2].mxu0 }
 0x1ae   : > { %841 = vst.msk [vmem:[%s1543_s9 + $0x18] sm:$0xff] %vm627_vm3, %v1067_v25  ;;  %v809_v28 = vpop.f32.mrb[3].mxu0  ;;  %v872_v29 = vmul.f32 %v1067_v25, %v1067_v25  ;;  %v851_v32 = vsel %vm627_vm3, %v1067_v25, 0.0 }
 0x1af   : > { %840 = vst.msk [vmem:[%s1543_s9 + $0x10] sm:$0xff] %vm627_vm3, %v809_v28  ;;  %v849_v9 = vsel %vm627_vm3, %v809_v28, 0.0  ;;  %v871_v30 = vmul.f32 %v809_v28, %v809_v28 }
 0x1b0   : > { %v850_v31 = vadd.f32 %v849_v9, %v848_v10  ;;  %v882_v38 = vsel %vm627_vm3, %v872_v29, 0.0 }
 0x1b1   : > { %v880_v33 = vsel %vm627_vm3, %v871_v30, 0.0 }
 0x1b2   : > { %v852_v34 = vadd.f32 %v851_v32, %v850_v31  ;;  %v881_v35 = vadd.f32 %v880_v33, %v879_v48 }
 0x1b4   : > { %v883_v2 = vadd.f32 %v882_v38, %v881_v35 }
 0x1cd   : > { %v1070_v39 = vpop.f32.mrb[0].mxu1 }
 0x1ce   : > { %843 = vst.msk [vmem:[%s1543_s9 + $0x28] sm:$0xff] %vm627_vm3, %v1070_v39  ;;  %v819_v40 = vpop.f32.mrb[1].mxu1  ;;  %v874_v41 = vmul.f32 %v1070_v39, %v1070_v39  ;;  %v855_v45 = vsel %vm627_vm3, %v1070_v39, 0.0 }
 0x1cf   : > { %842 = vst.msk [vmem:[%s1543_s9 + $0x20] sm:$0xff] %vm627_vm3, %v819_v40  ;;  %v853_v42 = vsel %vm627_vm3, %v819_v40, 0.0  ;;  %v873_v43 = vmul.f32 %v819_v40, %v819_v40 }
 0x1d0   : > { %v854_v44 = vadd.f32 %v853_v42, %v852_v34  ;;  %v886_v47 = vsel %vm627_vm3, %v874_v41, 0.0 }
 0x1d1   : > { %v884_v46 = vsel %vm627_vm3, %v873_v43, 0.0 }
 0x1d2   : > { %v885_v54 = vadd.f32 %v884_v46, %v883_v2  ;;  %v856_v37 = vadd.f32 %v855_v45, %v854_v44 }
 0x1d4   : > { %v887_v49 = vadd.f32 %v886_v47, %v885_v54 }
 0x1da   : > { %v1073_v50 = vpop.f32.mrb[2].mxu1 }
 0x1db   : > { %845 = vst.msk [vmem:[%s1543_s9 + $0x38] sm:$0xff] %vm627_vm3, %v1073_v50  ;;  %v829_v51 = vpop.f32.mrb[3].mxu1  ;;  %v876_v53 = vmul.f32 %v1073_v50, %v1073_v50  ;;  %v859_v52 = vsel %vm627_vm3, %v1073_v50, 0.0 }
 0x1dc   : > { %844 = vst.msk [vmem:[%s1543_s9 + $0x30] sm:$0xff] %vm627_vm3, %v829_v51  ;;  %v857_v8 = vsel %vm627_vm3, %v829_v51, 0.0  ;;  %v875_v55 = vmul.f32 %v829_v51, %v829_v51 }
 0x1dd   : > { %v858_v56 = vadd.f32 %v857_v8, %v856_v37  ;;  %v890_v58 = vsel %vm627_vm3, %v876_v53, 0.0 }
 0x1de   : > { %v888_v60 = vsel %vm627_vm3, %v875_v55, 0.0 }
 0x1df   : > { %v860_v11 = vadd.f32 %v859_v52, %v858_v56  ;;  %v889_v57 = vadd.f32 %v888_v60, %v887_v49 }
 0x1e1   : > { %v861_v59 = vrot.slane %v860_v11, 4  ;;  %v891_v62 = vadd.f32 %v890_v58, %v889_v57 }
 0x1e3   : > { %v862_v63 = vadd.f32 %v861_v59, %v860_v11  ;;  %v892_v3 = vrot.slane %v891_v62, 4 }
 0x1e5   : > { %v863_v5 = vrot.slane %v862_v63, 2  ;;  %v893_v61 = vadd.f32 %v892_v3, %v891_v62 }
 0x1e7   : > { %v864_v0 = vadd.f32 %v863_v5, %v862_v63  ;;  %v894_v6 = vrot.slane %v893_v61, 2 }
 0x1e9   : > { %v865_v7 = vrot.slane %v864_v0, 1  ;;  %v895_v1 = vadd.f32 %v894_v6, %v893_v61 }
 0x1eb   : > { %v866_v12 = vadd.f32 %v865_v7, %v864_v0  ;;  %v896_v4 = vrot.slane %v895_v1, 1 }
 0x1ed   : > { %868 = vst.msk [vmem:[%s265_s11] sm:$0x1] %vm867_vm12, %v866_v12  ;;  %v897_v13 = vadd.f32 %v896_v4, %v895_v1 }
 0x1ef   : > { %898 = vst.msk [vmem:[%s268_s19] sm:$0x1] %vm867_vm12, %v897_v13 }
 0x1f0 PF: > { %s17_s21 = sadd.s32 1, %s1123_s21  }
 0x1f1   : > { %p14_p4 = scmp.ge.s32.totalorder %s17_s21, 4  }
 0x1f3   :  { %16 = sbr.rel (!%p14_p4) target bundleno = 1 (0x1), region = 90 }

// kernel: down_forward.3
= control target key start
LH: loop header
LB: loop body
LE: loop exit
PB: predicated region body
PF: predicated region fallthrough
CT: control target
= control target key end

     0   :  { %s1109_s15 = smov 0   ;;  %s1478_s0 = inlined_call_operand.vmem [shape: f32[2,8,2,8,8], index: 0, kind: input, shape index: {}]   ;;  %s1479_s1 = inlined_call_operand.vmem [shape: f32[36,8], index: 1, kind: input, shape index: {}]   ;;  %s1480_s2 = inlined_call_operand.vmem [shape: f32[2,8,8,8], index: 2, kind: output, shape index: {0}]   ;;  %s1481_s3 = inlined_call_operand.vmem [shape: f32[2,1,8], index: 3, kind: output, shape index: {1}]   ;;  %s1482_s4 = inlined_call_operand.vmem [shape: f32[2,1,8], index: 4, kind: output, shape index: {2}]  }
   0x1 LB: > { %s969_s16 = sadd.s32 4294967295, %s1072_s15   ;;  %p973_p0 = scmp.ge.s32.totalorder %s1072_s15, 1  ;;  %s1072_s15 = sphi %s1109_s15, %s15_s15  }
   0x2   : > { %p167_p1 = scmp.lt.s32.totalorder %s1072_s15, 3 }
   0x4   : > { %p168_p2 = pnand %p973_p0, %p167_p1 }
   0x5   : > { %p199_p3 = scmp.lt.s32.totalorder (!%p168_p2), %s969_s16, 1  ;;  %s1074_s21 = smov (!%p168_p2), 124   ;;  %v1075_v16 = vmov (!%p168_p2), 0.0   ;;  %vm307_vm0 = vcmask (!%p168_p2), 1040384   ;;  %vm342_vm1 = vcmask (!%p168_p2), 1046528   ;;  %vm391_vm2 = vcmask (!%p168_p2), 1045504  }
   0x6   : > { %171 = sbr.rel (%p168_p2) target bundleno = 612 (0x264), region = 28  ;;  %v289_v17 = vrot.slane (!%p168_p2), %v1075_v16, 7  ;;  %s1076_s22 = smov (!%p168_p2), 4   ;;  %vm694_vm3 = vcmask (!%p168_p2), 1043456   ;;  %vm592_vm4 = vcmask (!%p168_p2), 31744   ;;  %vm601_vm5 = vcmask (!%p168_p2), 64512  }
   0x7   : > { %s1077_s23 = smov (!%p168_p2), 24   ;;  %s1078_s24 = smov (!%p168_p2), 8   ;;  %vm610_vm6 = vcmask (!%p168_p2), 97280   ;;  %vm619_vm7 = vcmask (!%p168_p2), 130048   ;;  %vm628_vm8 = vcmask (!%p168_p2), 162816   ;;  %vm637_vm9 = vcmask (!%p168_p2), 195584  }
   0x8   : > { %v1124_v24 = vsel (!%p168_p2), %vm307_vm0, 0.0, %v289_v17  ;;  %v317_v25 = vsel (!%p168_p2), %vm307_vm0, %v289_v17, 0.0  ;;  %s1079_s25 = smov (!%p168_p2), 12   ;;  %s1080_s26 = smov (!%p168_p2), 16   ;;  %vm646_vm10 = vcmask (!%p168_p2), 228352   ;;  %vm655_vm11 = vcmask (!%p168_p2), 261120  }
   0x9   : > { %v343_v28 = vrot.slane (!%p168_p2), %v1124_v24, 1  ;;  %v344_v29 = vrot.slane (!%p168_p2), %v317_v25, 1  ;;  %v392_v31 = vrot.slane (!%p168_p2), %v1124_v24, 2  ;;  %v393_v32 = vrot.slane (!%p168_p2), %v317_v25, 2  ;;  %s1081_s5 = smov (!%p168_p2), 20   ;;  %s1082_s12 = smov (!%p168_p2), 28  }
   0xa   : > { %s1083_s13 = smov (!%p168_p2), 32   ;;  %vm669_vm12 = vcmask (!%p168_p2), 293888   ;;  %vm832_vm13 = vcmask (!%p168_p2), 57344  }
   0xb   : > { %v1129_v30 = vsel (!%p168_p2), %vm342_vm1, %v343_v28, %v344_v29  ;;  %v1135_v33 = vsel (!%p168_p2), %vm391_vm2, %v392_v31, %v393_v32  ;;  %v664_v31 = vld [vmem:[%s1479_s1] sm:$0xff] (!%p168_p2)  ;;  %v665_v32 = vld [vmem:[%s1479_s1 + $0x8] sm:$0xff] (!%p168_p2) }
   0xd   : > { %s1484_s16 = smov (!%p199_p3, %s969_s16), 1 }
   0xe   : > { %s997_s17 = sshll.u32 %s1484_s16, 7  ;;  %s998_s14 = sshll.u32 %s1484_s16, 6 }
   0xf   : > { %s203_s20 = scalar_lea.vmem %s1478_s0, %s997_s17  ;;  %s1433_s19 = scalar_lea.vmem %s1480_s2, %s998_s14 }
  0x10   : > { %v215_v0 = vld [vmem:[%s203_s20] sm:$0xff]  ;;  %v978_v1 = vld [vmem:[%s203_s20 + $0x8] sm:$0xff]  ;;  %v216_v5 = vld [vmem:[%s203_s20 + $0x10] sm:$0xff] }
  0x11   : > { %v217_v2 = vld [vmem:[%s203_s20 + $0x20] sm:$0xff]  ;;  %v232_v3 = vmax.f32 %v215_v0, %v978_v1  ;;  %v980_v4 = vld [vmem:[%s203_s20 + $0x28] sm:$0xff]  ;;  %v979_v6 = vld [vmem:[%s203_s20 + $0x18] sm:$0xff] }
  0x12   : > { %v234_v7 = vmax.f32 %v217_v2, %v980_v4  ;;  %v218_v8 = vld [vmem:[%s203_s20 + $0x30] sm:$0xff]  ;;  %v981_v9 = vld [vmem:[%s203_s20 + $0x38] sm:$0xff]  ;;  %v233_v10 = vmax.f32 %v216_v5, %v979_v6  ;;  %v219_v12 = vld [vmem:[%s203_s20 + $0x40] sm:$0xff] }
  0x13   : > { %248 = vrot.lane.b32.xlu0 %v232_v3, %s1074_s21  ;;  %v235_v11 = vmax.f32 %v218_v8, %v981_v9  ;;  %v982_v13 = vld [vmem:[%s203_s20 + $0x48] sm:$0xff]  ;;  %v220_v14 = vld [vmem:[%s203_s20 + $0x50] sm:$0xff]  ;;  %v983_v15 = vld [vmem:[%s203_s20 + $0x58] sm:$0xff] }
  0x14   : > { %252 = vrot.lane.b32.xlu1 %v234_v7, %s1074_s21  ;;  %v236_v18 = vmax.f32 %v219_v12, %v982_v13  ;;  %v237_v19 = vmax.f32 %v220_v14, %v983_v15  ;;  %v221_v20 = vld [vmem:[%s203_s20 + $0x60] sm:$0xff]  ;;  %v984_v21 = vld [vmem:[%s203_s20 + $0x68] sm:$0xff]  ;;  %v222_v22 = vld [vmem:[%s203_s20 + $0x70] sm:$0xff] }
  0x15   : > { %v985_v23 = vld [vmem:[%s203_s20 + $0x78] sm:$0xff]  ;;  %v238_v26 = vmax.f32 %v221_v20, %v984_v21 }
  0x16   : > { %v239_v27 = vmax.f32 %v222_v22, %v985_v23 }
  0x17   : > { %250 = vrot.lane.b32.xlu0 %v233_v10, %s1074_s21 }
  0x18   : > { %254 = vrot.lane.b32.xlu1 %v235_v11, %s1074_s21 }
  0x1b   : > { %256 = vrot.lane.b32.xlu0 %v236_v18, %s1074_s21 }
  0x1c   : > { %258 = vrot.lane.b32.xlu1 %v237_v19, %s1074_s21 }
  0x1f   : > { %260 = vrot.lane.b32.xlu0 %v238_v26, %s1074_s21 }
  0x20   : > { %262 = vrot.lane.b32.xlu1 %v239_v27, %s1074_s21 }
  0x23   : > { %367 = vrot.lane.b32.xlu0 %v1129_v30, %s1076_s22 }
  0x24   : > { %534 = vrot.lane.b32.xlu1 %v1124_v24, %s1077_s23 }
  0x27   : > { %416 = vrot.lane.b32.xlu0 %v1135_v33, %s1078_s24 }
  0x85   : > { %v249_v34 = vpop.permute.xlu0 %248 }
  0x86   : > { %v272_v35 = vmax.f32 %v232_v3, %v249_v34  ;;  %v253_v36 = vpop.permute.xlu1 %252  ;;  %v1034_v34 = vpack.c.bf16 %v665_v32, %v664_v31 }
  0x87   : > { %v274_v37 = vmax.f32 %v234_v7, %v253_v36 }
  0x88   : > { %v290_v38 = vrot.slane %v272_v35, 7  ;;  %1035 = vmatprep.subr.bf16.mxu0 %v1034_v34  ;;  %1042 = vmatprep.subr.bf16.mxu1 %v1034_v34 }
  0x89   : > { %v292_v39 = vrot.slane %v274_v37, 7  ;;  %v251_v40 = vpop.permute.xlu0 %250  ;;  %1037 = vmatpush3.bf16.msra.mxu0 %v1034_v34  ;;  %1045 = vmatpush3.bf16.msra.mxu1 %v1034_v34  ;;  %v666_v37 = vld [vmem:[%s1479_s1 + $0x10] sm:$0xff] }
  0x8a   : > { %v1142_v41 = vsel %vm307_vm0, 0.0, %v290_v38  ;;  %v273_v42 = vmax.f32 %v233_v10, %v251_v40  ;;  %v255_v43 = vpop.permute.xlu1 %254  ;;  %v318_v9 = vsel %vm307_vm0, %v290_v38, 0.0  ;;  %v667_v38 = vld [vmem:[%s1479_s1 + $0x18] sm:$0xff] }
  0x8b   : > { %441 = vrot.lane.b32.xlu0 %v1142_v41, %s1079_s25  ;;  %v1147_v44 = vsel %vm307_vm0, 0.0, %v292_v39  ;;  %v275_v46 = vmax.f32 %v235_v11, %v255_v43  ;;  %v347_v10 = vrot.slane %v318_v9, 1  ;;  %v346_v11 = vrot.slane %v1142_v41, 1  ;;  %v668_v43 = vld [vmem:[%s1479_s1 + $0x20] sm:$0xf] }
  0x8c   : > { %v291_v45 = vrot.slane %v273_v42, 7  ;;  %v396_v13 = vrot.slane %v318_v9, 2  ;;  %v395_v17 = vrot.slane %v1142_v41, 2  ;;  %v352_v22 = vrot.slane %v1147_v44, 1 }
  0x8d   : > { %v257_v47 = vpop.permute.xlu0 %256  ;;  %v1152_v49 = vrot.slane %v275_v46, 7  ;;  %v348_v15 = vsel %vm342_vm1, %v346_v11, %v347_v10  ;;  %v401_v29 = vrot.slane %v1147_v44, 2 }
  0x8e   : > { %v1150_v48 = vsel %vm307_vm0, 0.0, %v291_v45  ;;  %v276_v50 = vmax.f32 %v236_v18, %v257_v47  ;;  %v259_v51 = vpop.permute.xlu1 %258  ;;  %v319_v12 = vsel %vm307_vm0, %v291_v45, 0.0  ;;  %v320_v18 = vsel %vm307_vm0, %v292_v39, 0.0 }
  0x8f   : > { %522 = vrot.lane.b32.xlu0 %v1147_v44, %s1077_s23  ;;  %443 = vrot.lane.b32.xlu1 %v1150_v48, %s1079_s25  ;;  %v1160_v52 = vsel %vm307_vm0, 0.0, %v1152_v49  ;;  %v277_v54 = vmax.f32 %v237_v19, %v259_v51  ;;  %v350_v14 = vrot.slane %v319_v12, 1  ;;  %v349_v16 = vrot.slane %v1150_v48, 1 }
  0x90   : > { %v1162_v53 = vrot.slane %v276_v50, 7  ;;  %v353_v19 = vrot.slane %v320_v18, 1  ;;  %v397_v21 = vsel %vm391_vm2, %v395_v17, %v396_v13  ;;  %v399_v23 = vrot.slane %v319_v12, 2 }
  0x91   : > { %v261_v55 = vpop.permute.xlu0 %260  ;;  %v1172_v58 = vrot.slane %v277_v54, 7  ;;  %v351_v20 = vsel %vm342_vm1, %v349_v16, %v350_v14  ;;  %v321_v36 = vsel %vm307_vm0, %v1152_v49, 0.0  ;;  %v1038_v39 = vpack.c.bf16 %v667_v38, %v666_v37 }
  0x92   : > { %v263_v56 = vpop.permute.xlu1 %262  ;;  %v1170_v57 = vsel %vm307_vm0, 0.0, %v1162_v53  ;;  %v278_v59 = vmax.f32 %v238_v26, %v261_v55  ;;  %v354_v25 = vsel %vm342_vm1, %v352_v22, %v353_v19  ;;  %v398_v26 = vrot.slane %v1150_v48, 2 }
  0x93   : > { %447 = vrot.lane.b32.xlu0 %v1160_v52, %s1079_s25  ;;  %520 = vrot.lane.b32.xlu1 %v1150_v48, %s1077_s23  ;;  %v279_v60 = vmax.f32 %v239_v27, %v263_v56  ;;  %v1180_v62 = vsel %vm307_vm0, 0.0, %v1172_v58  ;;  %v402_v27 = vrot.slane %v320_v18, 2  ;;  %v356_v40 = vrot.slane %v321_v36, 1 }
  0x94   : > { %v1182_v63 = vrot.slane %v278_v59, 7  ;;  %v400_v28 = vsel %vm391_vm2, %v398_v26, %v399_v23  ;;  %v355_v42 = vrot.slane %v1160_v52, 1  ;;  %1039 = vmatprep.subr.bf16.mxu0 %v1038_v39  ;;  %1043 = vmatprep.subr.bf16.mxu1 %v1038_v39  ;;  %v322_v46 = vsel %vm307_vm0, %v1162_v53, 0.0 }
  0x95   : > { %v297_v61 = vrot.slane %v279_v60, 7  ;;  %v403_v35 = vsel %vm391_vm2, %v401_v29, %v402_v27  ;;  %1041 = vmatpush3.bf16.msra.mxu0 %v1038_v39  ;;  %1046 = vmatpush3.bf16.msra.mxu1 %v1038_v39  ;;  %v359_v47 = vrot.slane %v322_v46, 1  ;;  %v358_v49 = vrot.slane %v1170_v57, 1  ;;  %v368_v13 = vpop.permute.xlu0 %367 }
  0x96   : > { %v1192_v5 = vsel %vm307_vm0, 0.0, %v1182_v63  ;;  %1020 = vmatprep.subr.msk.mxu0 %vm694_vm3, %v668_v43  ;;  %1044 = vmatprep.subr.msk.mxu1 %vm694_vm3, %v668_v43  ;;  %v357_v45 = vsel %vm342_vm1, %v355_v42, %v356_v40  ;;  %v405_v50 = vrot.slane %v321_v36, 2  ;;  %v404_v54 = vrot.slane %v1160_v52, 2 }
  0x97   : > { %445 = vrot.lane.b32.xlu1 %v1147_v44, %s1079_s25  ;;  %526 = vrot.lane.b32.xlu0 %v1170_v57, %s1077_s23  ;;  %v325_v0 = vsel %vm307_vm0, %v297_v61, 0.0  ;;  %v316_v2 = vsel %vm307_vm0, 0.0, %v297_v61  ;;  %v360_v51 = vsel %vm342_vm1, %v358_v49, %v359_v47  ;;  %v408_v53 = vrot.slane %v322_v46, 2 }
  0x98   : > { %v467_v1 = vrot.slane %v325_v0, 1  ;;  %v494_v3 = vrot.slane %v325_v0, 2  ;;  %v466_v4 = vrot.slane %v316_v2, 1  ;;  %v493_v7 = vrot.slane %v316_v2, 2 }
  0x99   : > { %1021 = vmatpush3.msk.msra.mxu0 %vm694_vm3, %v668_v43  ;;  %1047 = vmatpush3.msk.msra.mxu1 %vm694_vm3, %v668_v43  ;;  %v406_v55 = vsel %vm391_vm2, %v404_v54, %v405_v50  ;;  %v407_v56 = vrot.slane %v1170_v57, 2  ;;  %v323_v60 = vsel %vm307_vm0, %v1172_v58, 0.0  ;;  %v361_v0 = vrot.slane %v1180_v62, 1  ;;  %v417_v14 = vpop.permute.xlu0 %416 }
  0x9a   : > { %v1195_v6 = vsel %vm342_vm1, %v466_v4, %v467_v1  ;;  %v1202_v8 = vsel %vm391_vm2, %v493_v7, %v494_v3  ;;  %v362_v61 = vrot.slane %v323_v60, 1  ;;  %v364_v3 = vrot.slane %v1192_v5, 1 }
  0x9b   : > { %524 = vrot.lane.b32.xlu1 %v1160_v52, %s1077_s23  ;;  %451 = vrot.lane.b32.xlu0 %v1180_v62, %s1079_s25  ;;  %v409_v59 = vsel %vm391_vm2, %v407_v56, %v408_v53  ;;  %v411_v4 = vrot.slane %v323_v60, 2  ;;  %v410_v9 = vrot.slane %v1180_v62, 2  ;;  %v413_v11 = vrot.slane %v1192_v5, 2 }
  0x9c   : > { %v363_v1 = vsel %vm342_vm1, %v361_v0, %v362_v61  ;;  %v593_v38 = vsel %vm592_vm4, %v1124_v24, %v368_v13 }
  0x9d   : > { %v412_v10 = vsel %vm391_vm2, %v410_v9, %v411_v4  ;;  %v602_v42 = vsel %vm601_vm5, %v593_v38, %v417_v14 }
  0x9f   : > { %449 = vrot.lane.b32.xlu1 %v1170_v57, %s1079_s25  ;;  %530 = vrot.lane.b32.xlu0 %v1192_v5, %s1077_s23 }
  0xa3   : > { %528 = vrot.lane.b32.xlu1 %v1180_v62, %s1077_s23  ;;  %455 = vrot.lane.b32.xlu0 %v316_v2, %s1079_s25 }
  0xa7   : > { %532 = vrot.lane.b32.xlu0 %v316_v2, %s1077_s23  ;;  %453 = vrot.lane.b32.xlu1 %v1192_v5, %s1079_s25  ;;  %v324_v2 = vsel %vm307_vm0, %v1182_v63, 0.0  ;;  %s214_s25 = scalar_lea.vmem %s1482_s4, %s1484_s16 }
  0xa8   : > { %v365_v58 = vrot.slane %v324_v2, 1  ;;  %v414_v63 = vrot.slane %v324_v2, 2 }
  0xaa   : > { %v366_v7 = vsel %vm342_vm1, %v364_v3, %v365_v58  ;;  %v415_v12 = vsel %vm391_vm2, %v413_v11, %v414_v63 }
  0xab   : > { %469 = vrot.lane.b32.xlu0 %v348_v15, %s1080_s26  ;;  %369 = vrot.lane.b32.xlu1 %v348_v15, %s1076_s22  ;;  %v1308_v15 = vpop.permute.xlu1 %534 }
  0xaf   : > { %471 = vrot.lane.b32.xlu0 %v351_v20, %s1080_s26  ;;  %418 = vrot.lane.b32.xlu1 %v397_v21, %s1078_s24 }
  0xb3   : > { %373 = vrot.lane.b32.xlu0 %v354_v25, %s1076_s22  ;;  %371 = vrot.lane.b32.xlu1 %v351_v20, %s1076_s22 }
  0xb7   : > { %498 = vrot.lane.b32.xlu0 %v400_v28, %s1081_s5  ;;  %496 = vrot.lane.b32.xlu1 %v397_v21, %s1081_s5 }
  0xbb   : > { %422 = vrot.lane.b32.xlu0 %v403_v35, %s1078_s24  ;;  %420 = vrot.lane.b32.xlu1 %v400_v28, %s1078_s24 }
  0xbf   : > { %546 = vrot.lane.b32.xlu0 %v354_v25, %s1082_s12  ;;  %544 = vrot.lane.b32.xlu1 %v351_v20, %s1082_s12 }
  0xc3   : > { %375 = vrot.lane.b32.xlu0 %v357_v45, %s1076_s22  ;;  %473 = vrot.lane.b32.xlu1 %v354_v25, %s1080_s26 }
  0xc7   : > { %500 = vrot.lane.b32.xlu0 %v403_v35, %s1081_s5  ;;  %568 = vrot.lane.b32.xlu1 %v400_v28, %s1083_s13 }
  0xcb   : > { %377 = vrot.lane.b32.xlu0 %v360_v51, %s1076_s22  ;;  %475 = vrot.lane.b32.xlu1 %v357_v45, %s1080_s26 }
  0xcf   : > { %502 = vrot.lane.b32.xlu0 %v406_v55, %s1081_s5  ;;  %570 = vrot.lane.b32.xlu1 %v403_v35, %s1083_s13 }
  0xd3   : > { %426 = vrot.lane.b32.xlu0 %v409_v59, %s1078_s24  ;;  %424 = vrot.lane.b32.xlu1 %v406_v55, %s1078_s24 }
  0xd7   : > { %550 = vrot.lane.b32.xlu0 %v360_v51, %s1082_s12  ;;  %548 = vrot.lane.b32.xlu1 %v357_v45, %s1082_s12 }
  0xdb   : > { %379 = vrot.lane.b32.xlu0 %v363_v1, %s1076_s22  ;;  %477 = vrot.lane.b32.xlu1 %v360_v51, %s1080_s26 }
  0xdf   : > { %504 = vrot.lane.b32.xlu0 %v409_v59, %s1081_s5  ;;  %572 = vrot.lane.b32.xlu1 %v406_v55, %s1083_s13 }
  0xe3   : > { %479 = vrot.lane.b32.xlu1 %v363_v1, %s1080_s26  ;;  %381 = vrot.lane.b32.xlu0 %v366_v7, %s1076_s22  ;;  %s211_s22 = scalar_lea.vmem %s1481_s3, %s1484_s16 }
  0xe7   : > { %574 = vrot.lane.b32.xlu1 %v409_v59, %s1083_s13  ;;  %506 = vrot.lane.b32.xlu0 %v412_v10, %s1081_s5 }
  0xeb   : > { %428 = vrot.lane.b32.xlu1 %v412_v10, %s1078_s24  ;;  %430 = vrot.lane.b32.xlu0 %v415_v12, %s1078_s24 }
  0xef   : > { %552 = vrot.lane.b32.xlu1 %v363_v1, %s1082_s12  ;;  %554 = vrot.lane.b32.xlu0 %v366_v7, %s1082_s12 }
  0xf3   : > { %481 = vrot.lane.b32.xlu1 %v366_v7, %s1080_s26  ;;  %483 = vrot.lane.b32.xlu0 %v1195_v6, %s1080_s26 }
  0xf7   : > { %576 = vrot.lane.b32.xlu1 %v412_v10, %s1083_s13  ;;  %578 = vrot.lane.b32.xlu0 %v415_v12, %s1083_s13 }
  0xfb   : > { %508 = vrot.lane.b32.xlu1 %v415_v12, %s1081_s5  ;;  %556 = vrot.lane.b32.xlu0 %v1195_v6, %s1082_s12 }
  0xfd   : > { %v442_v16 = vpop.permute.xlu0 %441 }
  0xfe   : > { %v611_v46 = vsel %vm610_vm6, %v602_v42, %v442_v16 }
  0xff   : > { %510 = vrot.lane.b32.xlu1 %v1202_v8, %s1081_s5  ;;  %580 = vrot.lane.b32.xlu0 %v1202_v8, %s1083_s13 }
 0x101   : > { %v444_v17 = vpop.permute.xlu1 %443  ;;  %v1314_v18 = vpop.permute.xlu0 %522 }
 0x103   : > { %558 = vrot.lane.b32.xlu1 %v1129_v30, %s1082_s12 }
 0x105   : > { %v521_v19 = vpop.permute.xlu1 %520  ;;  %v1318_v20 = vpop.permute.xlu0 %447 }
 0x107   : > { %582 = vrot.lane.b32.xlu1 %v1135_v33, %s1083_s13 }
 0x109   : > { %v446_v6 = vpop.permute.xlu1 %445  ;;  %v1322_v21 = vpop.permute.xlu0 %526 }
 0x10d   : > { %v525_v22 = vpop.permute.xlu1 %524  ;;  %v1324_v23 = vpop.permute.xlu0 %451 }
 0x111   : > { %v1326_v25 = vpop.permute.xlu1 %449  ;;  %v1328_v8 = vpop.permute.xlu0 %530 }
 0x115   : > { %v1330_v26 = vpop.permute.xlu1 %528  ;;  %v1332_v27 = vpop.permute.xlu0 %455 }
 0x119   : > { %v1334_v30 = vpop.permute.xlu1 %453  ;;  %v1336_v28 = vpop.permute.xlu0 %532 }
 0x11d   : > { %v370_v29 = vpop.permute.xlu1 %369  ;;  %v470_v33 = vpop.permute.xlu0 %469 }
 0x11e   : > { %v620_v47 = vsel %vm619_vm7, %v611_v46, %v470_v33  ;;  %v594_v24 = vsel %vm592_vm4, %v1142_v41, %v370_v29 }
 0x121   : > { %v419_v31 = vpop.permute.xlu1 %418  ;;  %v472_v32 = vpop.permute.xlu0 %471 }
 0x122   : > { %v603_v55 = vsel %vm601_vm5, %v594_v24, %v419_v31 }
 0x125   : > { %v372_v34 = vpop.permute.xlu1 %371  ;;  %v374_v35 = vpop.permute.xlu0 %373 }
 0x126   : > { %v595_v49 = vsel %vm592_vm4, %v1150_v48, %v372_v34  ;;  %v612_v48 = vsel %vm610_vm6, %v603_v55, %v444_v17  ;;  %v596_v4 = vsel %vm592_vm4, %v1147_v44, %v374_v35 }
 0x127   : > { %v621_v3 = vsel %vm619_vm7, %v612_v48, %v472_v32 }
 0x129   : > { %v497_v36 = vpop.permute.xlu1 %496  ;;  %v499_v37 = vpop.permute.xlu0 %498 }
 0x12a   : > { %v629_v50 = vsel %vm628_vm8, %v620_v47, %v497_v36  ;;  %v630_v7 = vsel %vm628_vm8, %v621_v3, %v499_v37 }
 0x12b   : > { %v638_v56 = vsel %vm637_vm9, %v629_v50, %v521_v19  ;;  %v639_v11 = vsel %vm637_vm9, %v630_v7, %v1314_v18 }
 0x12d   : > { %v421_v39 = vpop.permute.xlu1 %420  ;;  %v423_v40 = vpop.permute.xlu0 %422 }
 0x12e   : > { %v604_v51 = vsel %vm601_vm5, %v595_v49, %v421_v39  ;;  %v605_v9 = vsel %vm601_vm5, %v596_v4, %v423_v40 }
 0x12f   : > { %v613_v59 = vsel %vm610_vm6, %v604_v51, %v446_v6  ;;  %v614_v12 = vsel %vm610_vm6, %v605_v9, %v1318_v20 }
 0x131   : > { %v545_v43 = vpop.permute.xlu1 %544  ;;  %v547_v45 = vpop.permute.xlu0 %546 }
 0x132   : > { %v647_v41 = vsel %vm646_vm10, %v638_v56, %v545_v43  ;;  %v648_v13 = vsel %vm646_vm10, %v639_v11, %v547_v45 }
 0x135   : > { %v474_v54 = vpop.permute.xlu1 %473  ;;  %v376_v53 = vpop.permute.xlu0 %375 }
 0x136   : > { %v622_v60 = vsel %vm619_vm7, %v613_v59, %v474_v54  ;;  %v597_v20 = vsel %vm592_vm4, %v1160_v52, %v376_v53 }
 0x139   : > { %v569_v61 = vpop.permute.xlu1 %568  ;;  %v501_v0 = vpop.permute.xlu0 %500 }
 0x13a   : > { %v631_v1 = vsel %vm628_vm8, %v622_v60, %v501_v0  ;;  %v656_v2 = vsel %vm655_vm11, %v647_v41, %v569_v61 }
 0x13b   : > { %1022 = vmatprep.mubr.msk.f32.mxu0 %vm669_vm12, %v656_v2  ;;  %v640_v58 = vsel %vm637_vm9, %v631_v1, %v525_v22 }
 0x13d   : > { %v476_v63 = vpop.permute.xlu1 %475  ;;  %v378_v10 = vpop.permute.xlu0 %377 }
 0x13e   : > { %v623_v14 = vsel %vm619_vm7, %v614_v12, %v476_v63 }
 0x141   : > { %v571_v16 = vpop.permute.xlu1 %570  ;;  %v503_v17 = vpop.permute.xlu0 %502 }
 0x142   : > { %v657_v44 = vsel %vm655_vm11, %v648_v13, %v571_v16  ;;  %v632_v19 = vsel %vm628_vm8, %v623_v14, %v503_v17 }
 0x143   : > { %1023 = vmatmul.mubr.msk.f32.vlgmr.msra.gmra.mrb[0].mxu0 %vm669_vm12, %v657_v44  ;;  %v641_v6 = vsel %vm637_vm9, %v632_v19, %v1322_v21 }
 0x145   : > { %v425_v22 = vpop.permute.xlu1 %424  ;;  %v427_v18 = vpop.permute.xlu0 %426 }
 0x146   : > { %v606_v31 = vsel %vm601_vm5, %v597_v20, %v425_v22 }
 0x147   : > { %v615_v35 = vsel %vm610_vm6, %v606_v31, %v1326_v25 }
 0x149   : > { %v549_v29 = vpop.permute.xlu1 %548  ;;  %v551_v33 = vpop.permute.xlu0 %550 }
 0x14a   : > { %v649_v36 = vsel %vm646_vm10, %v640_v58, %v549_v29  ;;  %v650_v45 = vsel %vm646_vm10, %v641_v6, %v551_v33 }
 0x14d   : > { %v478_v32 = vpop.permute.xlu1 %477  ;;  %v380_v34 = vpop.permute.xlu0 %379 }
 0x14e   : > { %v624_v37 = vsel %vm619_vm7, %v615_v35, %v478_v32 }
 0x151   : > { %v573_v38 = vpop.permute.xlu1 %572  ;;  %v505_v21 = vpop.permute.xlu0 %504 }
 0x152   : > { %v658_v39 = vsel %vm655_vm11, %v649_v36, %v573_v38  ;;  %v633_v40 = vsel %vm628_vm8, %v624_v37, %v505_v21 }
 0x153   : > { %1025 = vmatprep.mubr.msk.f32.mxu0 %vm669_vm12, %v658_v39  ;;  %v642_v52 = vsel %vm637_vm9, %v633_v40, %v1330_v26  ;;  %v598_v26 = vsel %vm592_vm4, %v1170_v57, %v378_v10  ;;  %v599_v57 = vsel %vm592_vm4, %v1180_v62, %v380_v34 }
 0x154   : > { %v607_v53 = vsel %vm601_vm5, %v598_v26, %v427_v18 }
 0x155   : > { %v480_v42 = vpop.permute.xlu1 %479  ;;  %v382_v43 = vpop.permute.xlu0 %381  ;;  %v616_v59 = vsel %vm610_vm6, %v607_v53, %v1324_v23 }
 0x156   : > { %v600_v49 = vsel %vm592_vm4, %v1192_v5, %v382_v43  ;;  %v625_v48 = vsel %vm619_vm7, %v616_v59, %v480_v42 }
 0x159   : > { %v575_v25 = vpop.permute.xlu1 %574  ;;  %v507_v46 = vpop.permute.xlu0 %506 }
 0x15a   : > { %v659_v47 = vsel %vm655_vm11, %v650_v45, %v575_v25  ;;  %v634_v5 = vsel %vm628_vm8, %v625_v48, %v507_v46 }
 0x15b   : > { %1026 = vmatmul.mubr.msk.f32.gmra.mrb[2].mxu0 %vm669_vm12, %v659_v47 }
 0x15d   : > { %v429_v24 = vpop.permute.xlu1 %428  ;;  %v431_v50 = vpop.permute.xlu0 %430 }
 0x15e   : > { %v609_v51 = vsel %vm601_vm5, %v600_v49, %v431_v50  ;;  %v608_v0 = vsel %vm601_vm5, %v599_v57, %v429_v24 }
 0x15f   : > { %v618_v54 = vsel %vm610_vm6, %v609_v51, %v1332_v27  ;;  %v643_v27 = vsel %vm637_vm9, %v634_v5, %v1328_v8  ;;  %v617_v62 = vsel %vm610_vm6, %v608_v0, %v1334_v30 }
 0x161   : > { %v553_v55 = vpop.permute.xlu1 %552  ;;  %v555_v56 = vpop.permute.xlu0 %554 }
 0x162   : > { %v651_v1 = vsel %vm646_vm10, %v642_v52, %v553_v55  ;;  %v652_v23 = vsel %vm646_vm10, %v643_v27, %v555_v56 }
 0x165   : > { %v482_v41 = vpop.permute.xlu1 %481  ;;  %v484_v60 = vpop.permute.xlu0 %483 }
 0x166   : > { %v627_v61 = vsel %vm619_vm7, %v618_v54, %v484_v60  ;;  %v626_v8 = vsel %vm619_vm7, %v617_v62, %v482_v41 }
 0x169   : > { %v577_v2 = vpop.permute.xlu1 %576  ;;  %v579_v58 = vpop.permute.xlu0 %578 }
 0x16a   : > { %v661_v3 = vsel %vm655_vm11, %v652_v23, %v579_v58  ;;  %v660_v4 = vsel %vm655_vm11, %v651_v1, %v577_v2 }
 0x16b   : > { %1028 = vmatprep.mubr.msk.f32.mxu1 %vm669_vm12, %v660_v4 }
 0x16c   : > { %1029 = vmatmul.mubr.msk.f32.vlgmr.msra.gmra.mrb[0].mxu1 %vm669_vm12, %v661_v3 }
 0x16d   : > { %v509_v7 = vpop.permute.xlu1 %508  ;;  %v557_v9 = vpop.permute.xlu0 %556 }
 0x16e   : > { %v635_v63 = vsel %vm628_vm8, %v626_v8, %v509_v7 }
 0x16f   : > { %v644_v10 = vsel %vm637_vm9, %v635_v63, %v1336_v28 }
 0x170   : > { %v653_v11 = vsel %vm646_vm10, %v644_v10, %v557_v9 }
 0x171   : > { %v511_v12 = vpop.permute.xlu1 %510  ;;  %v581_v13 = vpop.permute.xlu0 %580 }
 0x172   : > { %v636_v14 = vsel %vm628_vm8, %v627_v61, %v511_v12  ;;  %v662_v30 = vsel %vm655_vm11, %v653_v11, %v581_v13 }
 0x173   : > { %1031 = vmatprep.mubr.msk.f32.mxu1 %vm669_vm12, %v662_v30  ;;  %v645_v16 = vsel %vm637_vm9, %v636_v14, %v1308_v15 }
 0x175   : > { %v559_v17 = vpop.permute.xlu1 %558 }
 0x176   : > { %v654_v44 = vsel %vm646_vm10, %v645_v16, %v559_v17 }
 0x179   : > { %v583_v19 = vpop.permute.xlu1 %582 }
 0x17a   : > { %v663_v6 = vsel %vm655_vm11, %v654_v44, %v583_v19 }
 0x17b   : > { %1032 = vmatmul.mubr.msk.f32.gmra.mrb[2].mxu1 %vm669_vm12, %v663_v6 }
 0x216   : > { %v1024_v28 = vpop.f32.mrb[0].mxu0 }
 0x217   : > { %804 = vst.msk [vmem:[%s1433_s19 + $0x8] sm:$0xff] %vm601_vm5, %v1024_v28  ;;  %v812_v15 = vsel %vm601_vm5, %v1024_v28, 0.0  ;;  %v835_v22 = vmul.f32 %v1024_v28, %v1024_v28  ;;  %v764_v18 = vpop.f32.mrb[1].mxu0 }
 0x218   : > { %803 = vst.msk [vmem:[%s1433_s19] sm:$0xff] %vm601_vm5, %v764_v18  ;;  %v811_v29 = vsel %vm601_vm5, %v764_v18, 0.0  ;;  %v834_v33 = vmul.f32 %v764_v18, %v764_v18 }
 0x219   : > { %v843_v20 = vsel %vm601_vm5, %v835_v22, 0.0  ;;  %v813_v31 = vadd.f32 %v812_v15, %v811_v29 }
 0x21a   : > { %v842_v32 = vsel %vm601_vm5, %v834_v33, 0.0 }
 0x21b   : > { %v844_v34 = vadd.f32 %v843_v20, %v842_v32 }
 0x22e   : > { %v1027_v35 = vpop.f32.mrb[2].mxu0 }
 0x22f   : > { %806 = vst.msk [vmem:[%s1433_s19 + $0x18] sm:$0xff] %vm601_vm5, %v1027_v35  ;;  %v774_v36 = vpop.f32.mrb[3].mxu0  ;;  %v837_v37 = vmul.f32 %v1027_v35, %v1027_v35  ;;  %v816_v40 = vsel %vm601_vm5, %v1027_v35, 0.0 }
 0x230   : > { %805 = vst.msk [vmem:[%s1433_s19 + $0x10] sm:$0xff] %vm601_vm5, %v774_v36  ;;  %v814_v38 = vsel %vm601_vm5, %v774_v36, 0.0  ;;  %v836_v21 = vmul.f32 %v774_v36, %v774_v36 }
 0x231   : > { %v815_v39 = vadd.f32 %v814_v38, %v813_v31  ;;  %v847_v45 = vsel %vm601_vm5, %v837_v37, 0.0 }
 0x232   : > { %v845_v52 = vsel %vm601_vm5, %v836_v21, 0.0 }
 0x233   : > { %v817_v42 = vadd.f32 %v816_v40, %v815_v39  ;;  %v846_v43 = vadd.f32 %v845_v52, %v844_v34 }
 0x235   : > { %v848_v25 = vadd.f32 %v847_v45, %v846_v43 }
 0x23f   : > { %v1030_v46 = vpop.f32.mrb[0].mxu1 }
 0x240   : > { %808 = vst.msk [vmem:[%s1433_s19 + $0x28] sm:$0xff] %vm601_vm5, %v1030_v46  ;;  %v784_v47 = vpop.f32.mrb[1].mxu1  ;;  %v839_v49 = vmul.f32 %v1030_v46, %v1030_v46  ;;  %v820_v26 = vsel %vm601_vm5, %v1030_v46, 0.0 }
 0x241   : > { %807 = vst.msk [vmem:[%s1433_s19 + $0x20] sm:$0xff] %vm601_vm5, %v784_v47  ;;  %v818_v24 = vsel %vm601_vm5, %v784_v47, 0.0  ;;  %v838_v50 = vmul.f32 %v784_v47, %v784_v47 }
 0x242   : > { %v819_v51 = vadd.f32 %v818_v24, %v817_v42  ;;  %v851_v56 = vsel %vm601_vm5, %v839_v49, 0.0 }
 0x243   : > { %v849_v54 = vsel %vm601_vm5, %v838_v50, 0.0 }
 0x244   : > { %v850_v53 = vadd.f32 %v849_v54, %v848_v25  ;;  %v821_v55 = vadd.f32 %v820_v26, %v819_v51 }
 0x246   : > { %v852_v59 = vadd.f32 %v851_v56, %v850_v53 }
 0x24e   : > { %v1033_v48 = vpop.f32.mrb[2].mxu1 }
 0x24f   : > { %810 = vst.msk [vmem:[%s1433_s19 + $0x38] sm:$0xff] %vm601_vm5, %v1033_v48  ;;  %v794_v5 = vpop.f32.mrb[3].mxu1  ;;  %v841_v41 = vmul.f32 %v1033_v48, %v1033_v48  ;;  %v824_v27 = vsel %vm601_vm5, %v1033_v48, 0.0 }
 0x250   : > { %809 = vst.msk [vmem:[%s1433_s19 + $0x30] sm:$0xff] %vm601_vm5, %v794_v5  ;;  %v822_v60 = vsel %vm601_vm5, %v794_v5, 0.0  ;;  %v840_v61 = vmul.f32 %v794_v5, %v794_v5 }
 0x251   : > { %v823_v57 = vadd.f32 %v822_v60, %v821_v55  ;;  %v855_v2 = vsel %vm601_vm5, %v841_v41, 0.0 }
 0x252   : > { %v853_v0 = vsel %vm601_vm5, %v840_v61, 0.0 }
 0x253   : > { %v825_v1 = vadd.f32 %v824_v27, %v823_v57  ;;  %v854_v23 = vadd.f32 %v853_v0, %v852_v59 }
 0x255   : > { %v826_v58 = vrot.slane %v825_v1, 4  ;;  %v856_v3 = vadd.f32 %v855_v2, %v854_v23 }
 0x257   : > { %v827_v4 = vadd.f32 %v826_v58, %v825_v1  ;;  %v857_v62 = vrot.slane %v856_v3, 4 }
 0x259   : > { %v828_v8 = vrot.slane %v827_v4, 2  ;;  %v858_v7 = vadd.f32 %v857_v62, %v856_v3 }
 0x25b   : > { %v829_v9 = vadd.f32 %v828_v8, %v827_v4  ;;  %v859_v63 = vrot.slane %v858_v7, 2 }
 0x25d   : > { %v830_v10 = vrot.slane %v829_v9, 1  ;;  %v860_v11 = vadd.f32 %v859_v63, %v858_v7 }
 0x25f   : > { %v831_v12 = vadd.f32 %v830_v10, %v829_v9  ;;  %v861_v13 = vrot.slane %v860_v11, 1 }
 0x261   : > { %833 = vst.msk [vmem:[%s211_s22] sm:$0x1] %vm832_vm13, %v831_v12  ;;  %v862_v14 = vadd.f32 %v861_v13, %v860_v11 }
 0x263   : > { %863 = vst.msk [vmem:[%s214_s25] sm:$0x1] %vm832_vm13, %v862_v14 }
 0x264 PF: > { %s15_s15 = sadd.s32 1, %s1072_s15  }
 0x265   : > { %p12_p4 = scmp.ge.s32.totalorder %s15_s15, 4  }
 0x267   :  { %14 = sbr.rel (!%p12_p4) target bundleno = 1 (0x1), region = 83 }

</bundles_post_ra>
